<compile_context>
chip_gen: v7x
topology: tpu7x:2x2x1
jax: 0.10.0
libtpu: 0.0.40
codegen_flags: <defaults>
</compile_context>

<pallas_src>
import functools

import jax
import jax.numpy as jnp
from jax.experimental import pallas as pl
from jax.experimental.pallas import tpu as pltpu


def channel_attn_kernel(x_ref, w1_ref, t1_ref, w2_ref, t2_ref, o_ref, acc_ref,
                        *, hw_total, hw_tile, lane_acc):
    """Grid = (n_blocks, hw_blocks); hw (reduction) is the last axis.

    x_ref   : (n_tile, C, hw_tile)   input tile, native dtype
    w1_ref  : (C, mid)               conv1 weight^T with BN scale folded in
    t1_ref  : (1, mid)               conv1 bias + BN shift
    w2_ref  : (mid, C)               conv2 weight^T with BN scale folded in
    t2_ref  : (1, C)                 conv2 bias + BN shift
    o_ref   : (n_tile, 1, C)         output block (resident across hw axis)
    acc_ref : (n_tile, C, 128) f32   lane-wise running spatial sum
              (falls back to (n_tile, C) when hw_tile is not a multiple of 128)
    """
    k = pl.program_id(1)
    last = pl.num_programs(1) - 1

    @pl.when(k == 0)
    def _():
        acc_ref[...] = jnp.zeros_like(acc_ref)

    def accumulate(masked):
        x = x_ref[...].astype(jnp.float32)            # (n_tile, C, hw_tile)
        if masked:
            # Mask BEFORE accumulating: out-of-range lanes can hold arbitrary
            # garbage (incl. NaN/Inf) -> must use select, never multiply-by-mask.
            lane = jax.lax.broadcasted_iota(jnp.int32, x.shape, dimension=2)
            x = jnp.where(k * hw_tile + lane < hw_total, x, 0.0)
        if lane_acc:
            nt, c, _ = x.shape
            # Pure VALU adds: sum corresponding 128-lane vreg groups; the
            # cross-lane (XLU) reduce is deferred to the epilogue.
            acc_ref[...] += x.reshape(nt, c, hw_tile // 128, 128).sum(axis=2)
        else:
            acc_ref[...] += jnp.sum(x, axis=-1)

    if hw_total % hw_tile != 0:
        # Only the final hw step needs the partial-tile mask; keep the hot
        # path unmasked (pl.when cold paths cost nothing at runtime).
        @pl.when(k < last)
        def _():
            accumulate(masked=False)

        @pl.when(k == last)
        def _():
            accumulate(masked=True)
    else:
        accumulate(masked=False)

    @pl.when(k == last)
    def _():
        if lane_acc:
            pooled = acc_ref[...].sum(axis=-1)        # one XLU reduce per block
        else:
            pooled = acc_ref[...]
        pooled = pooled * jnp.float32(1.0 / hw_total)            # global avg pool
        h = jnp.dot(pooled, w1_ref[...], preferred_element_type=jnp.float32)
        h = jnp.maximum(h + t1_ref[...], 0.0)                    # conv1 + BN + ReLU
        y = jnp.dot(h, w2_ref[...], preferred_element_type=jnp.float32)
        y = jnp.maximum(y + t2_ref[...], 0.0)                    # conv2 + BN + ReLU
        o_ref[...] = y[:, None, :].astype(o_ref.dtype)


def _vmem_plan():
    """Return (x_buffer_budget_bytes, vmem_limit_bytes) per TPU generation."""
    try:
        phys = int(pltpu.get_tpu_info().vmem_capacity_bytes)
    except Exception:
        phys = None
    if phys is None:
        return 12 << 20, None                  # unknown chip: conservative
    if phys <= (80 << 20):                     # v7x-class: 64 MiB physical / TC
        return 32 << 20, 48 << 20
    return 48 << 20, 64 << 20                  # v5e / v6e: 128 MiB physical


def _choose_tiles(N, C, HW, itemsize, x_budget_bytes, target_buf_bytes=8 << 20):
    """Pick (n_tile, hw_tile).

    n_tile: keep >= 2 blocks on the parallel grid axis whenever N >= 2 so both
    v7x TensorCores get work (no cost on single-TC v5e/v6e); cap at 8 rows.
    A partial last N block is allowed (rows are independent; OOB rows are
    never written back).  For N == 1 a CORE_PARALLEL split of the HW reduction
    would be needed to use the second v7x core; not implemented here.

    hw_tile: full HW if it fits the per-buffer VMEM budget (single reduction
    step, no mask); otherwise a lane-dense multiple of 128 sized toward
    ~target_buf_bytes per (double-buffered) x buffer.
    """
    n_tile = min(8, N)
    while n_tile > 1 and pl.cdiv(N, n_tile) < 2:
        n_tile -= 1

    per_buf = max(1, x_budget_bytes // 2)      # double-buffered input
    row_bytes = max(1, n_tile * C * itemsize)  # bytes per spatial element
    max_hw = max(128, per_buf // row_bytes)
    if HW <= max_hw:
        hw_tile = HW
    else:
        hw_tile = min(max_hw, max(128, target_buf_bytes // row_bytes))
        hw_tile = max(128, (hw_tile // 128) * 128)
    return n_tile, hw_tile


def _x_block_spec(n_tile, C, hw_tile, extra_buffering):
    index_map = lambda n, k: (n, 0, k)
    if extra_buffering:
        # Short steps expose DMA issue latency; triple-buffer small tiles.
        try:
            return pl.BlockSpec((n_tile, C, hw_tile), index_map,
                                pipeline_mode=pl.Buffered(3))
        except TypeError:
            pass  # older BlockSpec signature: fall back to default 2 buffers
    return pl.BlockSpec((n_tile, C, hw_tile), index_map)


def channel_attn(x_nchw, params, *, hw_tile=None):
    N, C, H, W = x_nchw.shape
    HW = H * W
    # Keep the input in its native dtype (bf16/f32/...): the kernel casts in
    # vregs and accumulates in f32, so HBM traffic stays at the native width.
    x3 = x_nchw.reshape(N, C, HW)
    mid = params["w1"].shape[1]

    x_budget, vmem_limit = _vmem_plan()
    n_tile, auto_hw = _choose_tiles(N, C, HW, x3.dtype.itemsize, x_budget)
    if hw_tile is None:
        hw_tile = auto_hw
    else:
        hw_tile = min(int(hw_tile), HW)
        if hw_tile != HW:                      # keep lane-dense BlockSpec legal
            hw_tile = max(128, (hw_tile // 128) * 128)

    grid = (pl.cdiv(N, n_tile), pl.cdiv(HW, hw_tile))
    lane_acc = (hw_tile % 128 == 0)
    tile_bytes = n_tile * C * hw_tile * x3.dtype.itemsize
    extra_buffering = (grid[1] >= 4) and (tile_bytes < (1 << 20))

    acc_shape = (n_tile, C, 128) if lane_acc else (n_tile, C)
    kernel = functools.partial(channel_attn_kernel, hw_total=HW,
                               hw_tile=hw_tile, lane_acc=lane_acc)

    out = pl.pallas_call(
        kernel,
        out_shape=jax.ShapeDtypeStruct((N, 1, C), x3.dtype),
        grid_spec=pltpu.PrefetchScalarGridSpec(
            num_scalar_prefetch=0,
            grid=grid,
            in_specs=[
                _x_block_spec(n_tile, C, hw_tile, extra_buffering),
                pl.BlockSpec((C, mid), lambda n, k: (0, 0)),
                pl.BlockSpec((1, mid), lambda n, k: (0, 0)),
                pl.BlockSpec((mid, C), lambda n, k: (0, 0)),
                pl.BlockSpec((1, C), lambda n, k: (0, 0)),
            ],
            out_specs=pl.BlockSpec((n_tile, 1, C), lambda n, k: (n, 0, 0)),
            scratch_shapes=[pltpu.VMEM(acc_shape, jnp.float32)],
        ),
        compiler_params=pltpu.CompilerParams(
            dimension_semantics=("parallel", "arbitrary"),
            vmem_limit_bytes=vmem_limit,
        ),
        cost_estimate=pl.CostEstimate(
            flops=N * C * HW + 4 * N * C * mid,
            transcendentals=0,
            bytes_accessed=N * C * HW * x3.dtype.itemsize
            + (C * mid + mid * C + mid + C) * 4
            + N * C * x3.dtype.itemsize,
        ),
    )(x3, params["w1"], params["t1"], params["w2"], params["t2"])

    # match PyTorch output shape (N, C, 1, 1)
    return out.reshape(N, C, 1, 1)


def make_channel_attn_params(key, in_channels, reduction_rate=16, eps=1e-5):
    """Deterministic parameter init mirroring the PyTorch module's shapes,
    with eval-mode BatchNorm folded into the matmul weights/biases."""
    assert in_channels % reduction_rate == 0
    mid = in_channels // reduction_rate
    ks = jax.random.split(key, 12)

    def bn_params(kg, kb, km, kv, c):
        gamma = 1.0 + 0.1 * jax.random.normal(kg, (c,), jnp.float32)
        beta = 0.1 * jax.random.normal(kb, (c,), jnp.float32)
        mean = 0.1 * jax.random.normal(km, (c,), jnp.float32)
        var = jax.random.uniform(kv, (c,), jnp.float32, 0.5, 1.5)
        return gamma, beta, mean, var

    # conv1: (mid, C, 1, 1) weight, (mid,) bias
    w1 = 0.1 * jax.random.normal(ks[0], (mid, in_channels), jnp.float32)
    b1 = 0.1 * jax.random.normal(ks[1], (mid,), jnp.float32)
    g1, be1, m1, v1 = bn_params(ks[2], ks[3], ks[4], ks[5], mid)

    # conv2: (C, mid, 1, 1) weight, (C,) bias
    w2 = 0.1 * jax.random.normal(ks[6], (in_channels, mid), jnp.float32)
    b2 = 0.1 * jax.random.normal(ks[7], (in_channels,), jnp.float32)
    g2, be2, m2, v2 = bn_params(ks[8], ks[9], ks[10], ks[11], in_channels)

    # Fold BN (eval) + conv bias:
    #   BN(conv(x)) = (x @ W^T) * s + (b * s + beta - mean * s), s = gamma/sqrt(var+eps)
    # and additionally fold s into the matmul weight columns.
    s1 = g1 / jnp.sqrt(v1 + eps)
    t1 = b1 * s1 + (be1 - m1 * s1)
    s2 = g2 / jnp.sqrt(v2 + eps)
    t2 = b2 * s2 + (be2 - m2 * s2)

    return {
        "w1": w1.T * s1[None, :],            # (C, mid), BN scale folded in
        "t1": t1.reshape(1, mid),
        "w2": w2.T * s2[None, :],            # (mid, C), BN scale folded in
        "t2": t2.reshape(1, in_channels),
    }


def channel_attn_ref(x_nchw, params):
    """Pure-JAX reference for validation."""
    pooled = jnp.mean(x_nchw.astype(jnp.float32), axis=(2, 3))   # (N, C)
    h = jnp.maximum(pooled @ params["w1"] + params["t1"], 0.0)
    y = jnp.maximum(h @ params["w2"] + params["t2"], 0.0)
    return y.astype(x_nchw.dtype).reshape(*y.shape, 1, 1)


if __name__ == "__main__":
    key = jax.random.PRNGKey(0)
    k1, k2, k3, k4, kp = jax.random.split(key, 5)

    C = 64
    params = make_channel_attn_params(kp, in_channels=C, reduction_rate=16)

    # Case 1: primary shape -> single reduction step, lane-wise accumulator,
    #         grid[0] == 2 so the parallel axis is shardable across TCs.
    x1 = jax.random.normal(k1, (2, C, 16, 16), jnp.float32)
    out1 = jax.block_until_ready(channel_attn(x1, params))
    ref1 = channel_attn_ref(x1, params)
    assert out1.shape == (2, C, 1, 1)
    assert jnp.allclose(out1, ref1, atol=1e-5, rtol=1e-5), "mismatch (case 1)"

    # Case 2: forced small hw tile -> multi-step reduction with a partial,
    #         masked FINAL hw step only (HW = 18*18 = 324, tile = 128).
    x2 = jax.random.normal(k2, (2, C, 18, 18), jnp.float32)
    out2 = jax.block_until_ready(channel_attn(x2, params, hw_tile=128))
    ref2 = channel_attn_ref(x2, params)
    assert jnp.allclose(out2, ref2, atol=1e-5, rtol=1e-5), "mismatch (case 2)"

    # Case 3: odd batch -> partial last N block (relaxed n_tile choice).
    x3 = jax.random.normal(k3, (3, C, 16, 16), jnp.float32)
    out3 = jax.block_until_ready(channel_attn(x3, params))
    ref3 = channel_attn_ref(x3, params)
    assert out3.shape == (3, C, 1, 1)
    assert jnp.allclose(out3, ref3, atol=1e-5, rtol=1e-5), "mismatch (case 3)"

    # Case 4: bf16 input streamed at native width; output follows input dtype.
    x4 = jax.random.normal(k4, (2, C, 48, 48), jnp.bfloat16)
    out4 = jax.block_until_ready(channel_attn(x4, params))
    ref4 = channel_attn_ref(x4, params)
    assert out4.dtype == jnp.bfloat16
    assert jnp.allclose(out4.astype(jnp.float32), ref4.astype(jnp.float32),
                        atol=5e-2, rtol=5e-2), "mismatch (case 4)"

    print("KERNEL_OK")
</pallas_src>

<mosaic_0001>
module attributes {stable_mosaic.version = 11 : i64} {
  func.func @channel_attn_kernel(%arg0: i32, %arg1: i32, %arg2: memref<1x64x256xf32, #tpu.memory_space<vmem>>, %arg3: memref<64x4xf32, #tpu.memory_space<vmem>>, %arg4: memref<1x4xf32, #tpu.memory_space<vmem>>, %arg5: memref<4x64xf32, #tpu.memory_space<vmem>>, %arg6: memref<1x64xf32, #tpu.memory_space<vmem>>, %arg7: memref<1x1x64xf32, #tpu.memory_space<vmem>>, %arg8: memref<1x64x128xf32, #tpu.memory_space<vmem>>) attributes {dimension_semantics = [#tpu.dimension_semantics<parallel>, #tpu.dimension_semantics<arbitrary>], iteration_bounds = array<i64: 2, 1>, scalar_prefetch = 0 : i64, scratch_operands = 1 : i64, tpu.core_type = #tpu.core_type<tc>, window_params = [{transform_indices = @transform_0, window_bounds = array<i64: 1, 64, 256>}, {pipeline_mode = #tpu.pipeline_mode<synchronous>, transform_indices = @transform_1, window_bounds = array<i64: 64, 4>}, {pipeline_mode = #tpu.pipeline_mode<synchronous>, transform_indices = @transform_2, window_bounds = array<i64: 1, 4>}, {pipeline_mode = #tpu.pipeline_mode<synchronous>, transform_indices = @transform_3, window_bounds = array<i64: 4, 64>}, {pipeline_mode = #tpu.pipeline_mode<synchronous>, transform_indices = @transform_4, window_bounds = array<i64: 1, 64>}, {transform_indices = @transform_5, window_bounds = array<i64: 1, 1, 64>}]} {
    %c0_i32 = arith.constant 0 : i32
    %0 = arith.cmpi eq, %arg1, %c0_i32 : i32
    %1 = arith.extui %0 : i1 to i32
    %c0_i32_0 = arith.constant 0 : i32
    %2 = arith.cmpi ne, %1, %c0_i32_0 : i32
    scf.if %2 {
      %cst_11 = arith.constant 0.000000e+00 : f32
      %12 = vector.broadcast %cst_11 : f32 to vector<1x64x128xf32>
      %c0_12 = arith.constant 0 : index
      %c0_13 = arith.constant 0 : index
      %c0_14 = arith.constant 0 : index
      %13 = vector.load %arg8[%c0_12, %c0_13, %c0_14] : memref<1x64x128xf32, #tpu.memory_space<vmem>>, vector<1x64x128xf32>
      tpu.vector_store %arg8[%c0_12, %c0_13, %c0_14], %12 {strides = array<i32>} : memref<1x64x128xf32, #tpu.memory_space<vmem>>, vector<1x64x128xf32>,
    } else {
    }
    %c0 = arith.constant 0 : index
    %c0_1 = arith.constant 0 : index
    %c0_2 = arith.constant 0 : index
    %3 = vector.load %arg2[%c0, %c0_1, %c0_2] : memref<1x64x256xf32, #tpu.memory_space<vmem>>, vector<1x64x256xf32>
    %c0_3 = arith.constant 0 : index
    %c0_4 = arith.constant 0 : index
    %c0_5 = arith.constant 0 : index
    %4 = vector.load %arg8[%c0_3, %c0_4, %c0_5] : memref<1x64x128xf32, #tpu.memory_space<vmem>>, vector<1x64x128xf32>
    %5 = vector.shape_cast %3 : vector<1x64x256xf32> to vector<1x64x2x128xf32>
    %cst = arith.constant dense<0.000000e+00> : vector<1x64x128xf32>
    %6 = vector.multi_reduction <add>, %5, %cst [2] : vector<1x64x2x128xf32> to vector<1x64x128xf32>
    %7 = arith.addf %4, %6 : vector<1x64x128xf32>
    %c0_6 = arith.constant 0 : index
    %c0_7 = arith.constant 0 : index
    %c0_8 = arith.constant 0 : index
    %8 = vector.load %arg8[%c0_6, %c0_7, %c0_8] : memref<1x64x128xf32, #tpu.memory_space<vmem>>, vector<1x64x128xf32>
    tpu.vector_store %arg8[%c0_6, %c0_7, %c0_8], %7 {strides = array<i32>} : memref<1x64x128xf32, #tpu.memory_space<vmem>>, vector<1x64x128xf32>,
    %c0_i32_9 = arith.constant 0 : i32
    %9 = arith.cmpi eq, %arg1, %c0_i32_9 : i32
    %10 = arith.extui %9 : i1 to i32
    %c0_i32_10 = arith.constant 0 : i32
    %11 = arith.cmpi ne, %10, %c0_i32_10 : i32
    scf.if %11 {
      %c0_11 = arith.constant 0 : index
      %c0_12 = arith.constant 0 : index
      %c0_13 = arith.constant 0 : index
      %12 = vector.load %arg8[%c0_11, %c0_12, %c0_13] : memref<1x64x128xf32, #tpu.memory_space<vmem>>, vector<1x64x128xf32>
      %cst_14 = arith.constant dense<0.000000e+00> : vector<1x64xf32>
      %13 = vector.multi_reduction <add>, %12, %cst_14 [2] : vector<1x64x128xf32> to vector<1x64xf32>
      %cst_15 = arith.constant 3.906250e-03 : f32
      %14 = vector.broadcast %cst_15 : f32 to vector<1x64xf32>
      %15 = arith.mulf %13, %14 : vector<1x64xf32>
      %c0_16 = arith.constant 0 : index
      %c0_17 = arith.constant 0 : index
      %16 = vector.load %arg3[%c0_16, %c0_17] : memref<64x4xf32, #tpu.memory_space<vmem>>, vector<64x4xf32>
      %cst_18 = arith.constant dense<0.000000e+00> : vector<1x4xf32>
      %17 = tpu.matmul %15, %16, %cst_18 {dimension_numbers = #tpu.dot_dimension_numbers<[1], [0], [0], [1], [0, 0, 1, 1], [], []>} : vector<1x64xf32>, vector<64x4xf32>, vector<1x4xf32> -> vector<1x4xf32>
      %c0_19 = arith.constant 0 : index
      %c0_20 = arith.constant 0 : index
      %18 = vector.load %arg4[%c0_19, %c0_20] : memref<1x4xf32, #tpu.memory_space<vmem>>, vector<1x4xf32>
      %19 = arith.addf %17, %18 : vector<1x4xf32>
      %cst_21 = arith.constant 0.000000e+00 : f32
      %20 = vector.broadcast %cst_21 : f32 to vector<1x4xf32>
      %21 = arith.maximumf %19, %20 : vector<1x4xf32>
      %c0_22 = arith.constant 0 : index
      %c0_23 = arith.constant 0 : index
      %22 = vector.load %arg5[%c0_22, %c0_23] : memref<4x64xf32, #tpu.memory_space<vmem>>, vector<4x64xf32>
      %cst_24 = arith.constant dense<0.000000e+00> : vector<1x64xf32>
      %23 = tpu.matmul %21, %22, %cst_24 {dimension_numbers = #tpu.dot_dimension_numbers<[1], [0], [0], [1], [0, 0, 1, 1], [], []>} : vector<1x4xf32>, vector<4x64xf32>, vector<1x64xf32> -> vector<1x64xf32>
      %c0_25 = arith.constant 0 : index
      %c0_26 = arith.constant 0 : index
      %24 = vector.load %arg6[%c0_25, %c0_26] : memref<1x64xf32, #tpu.memory_space<vmem>>, vector<1x64xf32>
      %25 = arith.addf %23, %24 : vector<1x64xf32>
      %cst_27 = arith.constant 0.000000e+00 : f32
      %26 = vector.broadcast %cst_27 : f32 to vector<1x64xf32>
      %27 = arith.maximumf %25, %26 : vector<1x64xf32>
      %28 = vector.shape_cast %27 : vector<1x64xf32> to vector<1x1x64xf32>
      %c0_28 = arith.constant 0 : index
      %c0_29 = arith.constant 0 : index
      %c0_30 = arith.constant 0 : index
      %29 = vector.load %arg7[%c0_28, %c0_29, %c0_30] : memref<1x1x64xf32, #tpu.memory_space<vmem>>, vector<1x1x64xf32>
      tpu.vector_store %arg7[%c0_28, %c0_29, %c0_30], %28 {strides = array<i32>} : memref<1x1x64xf32, #tpu.memory_space<vmem>>, vector<1x1x64xf32>,
    } else {
    }
    return
  }
  func.func @transform_0(%arg0: i32, %arg1: i32) -> (i32, i32, i32) {
    %c0_i32 = arith.constant 0 : i32
    %c0_i32_0 = arith.constant 0 : i32
    return %arg0, %c0_i32, %arg1 : i32, i32, i32
  }
  func.func @transform_1(%arg0: i32, %arg1: i32) -> (i32, i32) {
    %c0_i32 = arith.constant 0 : i32
    %c0_i32_0 = arith.constant 0 : i32
    %c0_i32_1 = arith.constant 0 : i32
    return %c0_i32, %c0_i32_0 : i32, i32
  }
  func.func @transform_2(%arg0: i32, %arg1: i32) -> (i32, i32) {
    %c0_i32 = arith.constant 0 : i32
    %c0_i32_0 = arith.constant 0 : i32
    %c0_i32_1 = arith.constant 0 : i32
    return %c0_i32, %c0_i32_0 : i32, i32
  }
  func.func @transform_3(%arg0: i32, %arg1: i32) -> (i32, i32) {
    %c0_i32 = arith.constant 0 : i32
    %c0_i32_0 = arith.constant 0 : i32
    %c0_i32_1 = arith.constant 0 : i32
    return %c0_i32, %c0_i32_0 : i32, i32
  }
  func.func @transform_4(%arg0: i32, %arg1: i32) -> (i32, i32) {
    %c0_i32 = arith.constant 0 : i32
    %c0_i32_0 = arith.constant 0 : i32
    %c0_i32_1 = arith.constant 0 : i32
    return %c0_i32, %c0_i32_0 : i32, i32
  }
  func.func @transform_5(%arg0: i32, %arg1: i32) -> (i32, i32, i32) {
    %c0_i32 = arith.constant 0 : i32
    %c0_i32_0 = arith.constant 0 : i32
    %c0_i32_1 = arith.constant 0 : i32
    return %arg0, %c0_i32, %c0_i32_0 : i32, i32, i32
  }
}

</mosaic_0001>

<bundles_post_ra>
// kernel: tpu_custom_call.1
= control target key start
LH: loop header
LB: loop body
LE: loop exit
PB: predicated region body
PF: predicated region fallthrough
CT: control target
= control target key end

     0   :  { %10 = vsyncpa [#allocation4], 0  ;;  %s2607_s0 = inlined_call_operand.hbm [shape: f32[2,64,256], index: 0, kind: input, shape index: {}]   ;;  %s2608_s1 = inlined_call_operand.vmem [shape: f32[64,4], index: 1, kind: input, shape index: {}]   ;;  %s2609_s2 = inlined_call_operand.vmem [shape: f32[1,4], index: 2, kind: input, shape index: {}]   ;;  %s2610_s3 = inlined_call_operand.vmem [shape: f32[4,64], index: 3, kind: input, shape index: {}]   ;;  %s2611_s4 = inlined_call_operand.vmem [shape: f32[1,64], index: 4, kind: input, shape index: {}]   ;;  %s2612_s5 = inlined_call_operand.hbm [shape: f32[2,1,64], index: 5, kind: output, shape index: {}]  }
   0x1   :  { %12 = vsyncpa [#allocation4 + $0x1], 0 }
   0x2   :  { %13 = vsyncpa [#allocation5], 0 }
   0x3   :  { %15 = vsyncpa [#allocation5 + $0x1], 0  ;;  %s2062_s18 = smov 0   ;;  %s2064_s19 = smov 0  }
   0x4   :  { %s2066_s20 = smov 0   ;;  %s2068_s21 = smov 0  }
   0x5   :  { %s2070_s22 = smov 0   ;;  %s2072_s23 = smov 0  }
   0x6 LB: > { %s1777_s24 = sadd.s32 4294967295, %s2021_s23   ;;  %s1778_s25 = sadd.s32 4294967294, %s2021_s23   ;;  %s2021_s23 = sphi %s2072_s23, %s21_s23   ;;  %s2017_s22 = sphi %s2070_s22, %s2627_s22   ;;  %s2013_s21 = sphi %s2068_s21, %s2626_s21   ;;  %s2009_s20 = sphi %s2066_s20, %s2625_s20   ;;  %s2005_s19 = sphi %s2064_s19, %s2624_s19   ;;  %s2001_s18 = sphi %s2062_s18, %s2623_s18  }
   0x7   : > { %s33_s26 = sadd.s32 1, %s2017_s22  ;;  %s42_s27 = sadd.s32 1, %s2009_s20 }
   0x8   : > { %p35_p0 = scmp.ge.s32.totalorder %s33_s26, 2  ;;  %p49_p1 = scmp.ne.s32.totalorder %s2009_s20, %s2005_s19 }
   0x9   : > { %p50_p2 = scmp.eq.s32.totalorder %s2021_s23, 0  ;;  %p55_p3 = scmp.ne.s32.totalorder %s2005_s19, %s2001_s18 }
   0xa   : > { %s2629_s26 = smov (%p35_p0, %s33_s26), 0  ;;  %p56_p5 = scmp.eq.s32.totalorder %s1777_s24, 0 }
   0xb   : > { %p2103_p4 = por %p50_p2, %p49_p1  ;;  %s37_s29 = ssub.s32 %s2017_s22, %s2629_s26 }
   0xc   : > { %p163_p6 = scmp.eq.s32.totalorder %s1777_s24, 1  ;;  %p40_p7 = scmp.eq.s32.totalorder %s37_s29, 0 }
   0xd   : > { %p2109_p8 = por %p56_p5, %p55_p3  ;;  %p169_p10 = scmp.eq.s32.totalorder %s1778_s25, 1 }
   0xe   : > { %p2113_p9 = por %p163_p6, %p49_p1  ;;  %p1852_p13 = scmp.lt.s32.totalorder %s2021_s23, 2 }
   0xf   : > { %s2118_s7 = scalar_select %p40_p7, %s2009_s20, %s42_s27  }
  0x10   : > { %s2616_s6 = scalar_select %p2113_p9, 1, 0 }
  0x11   : > { %p2120_p11 = por %p169_p10, %p55_p3  ;;  %s201_s9 = sand.u32 1, %s2009_s20  }
  0x12   : > { %s1781_s10 = sshll.u32 %s201_s9, 7  ;;  %s1792_s11 = sshll.u32 %s2017_s22, 11 }
  0x13   : > { %s2617_s8 = scalar_select %p2120_p11, 1, 0 }
  0x14   : > { %s2131_s14 = scalar_lea.hbm %s2607_s0, %s1792_s11  ;;  %s205_s15 = scalar_lea.vmem [#allocation3], %s1781_s10 }
  0x15   : > { %s214_s16 = sshll.u32 %s205_s15, 4  ;;  %p2137_p0 = pnand %p1852_p13, %p2103_p4  ;;  %s2133_s16 = int_to_ptr.vmem [resolvable:$true] %s214_s16 }
  0x16   : > { %s2142_s24 = scalar_lea.sflag [#allocation4], %s201_s9  ;;  %s1909_s25 = scalar_lea.hbm %s2131_s14, 2048 }
  0x17   : > { %p1910_p2 = scmp.ne.s32.totalorder %s2131_s14, %s1909_s25  ;;  %p1911_p3 = pneg %p2137_p0 }
  0x18   : > { %s1914_s28 = scalar_lea.hbm %s2607_s0, 4096  ;;  %p1915_p4 = scmp.lt.u32.totalorder %s2131_s14, %s2607_s0 }
  0x19   : > { %p1912_p5 = pnand %p1911_p3, %p1910_p2  ;;  %p1916_p7 = scmp.lt.u32.totalorder %s1914_s28, %s1909_s25 }
  0x1a   : > { %p1918_p13 = scmp.lt.u32.totalorder %s1909_s25, %s2131_s14 }
  0x1b   : > { %p1913_p6 = pneg %p1912_p5  ;;  %p1917_p10 = por %p1916_p7, %p1915_p4 }
  0x1d   : > { %p1919_p12 = por %p1918_p13, %p1917_p10 }
  0x1f   : > { %p1920_p1 = pnand %p1919_p12, %p1913_p6 }
  0x21   : > { %1923 = shalt.err (!%p1920_p1)
}
  0x22   : > { %s1924_s9 = scalar_lea.vmem %s2133_s16, 2048  ;;  %s2023_s12 = smov [#allocation3]  }
  0x23   : > { %p1925_p2 = scmp.ne.s32.totalorder %s2133_s16, %s1924_s9  ;;  %s1929_s13 = sshll.u32 %s2023_s12, 4  ;;  %s1930_s13 = int_to_ptr.vmem [resolvable:$false] %s1929_s13 }
  0x24   : > { %s1931_s15 = scalar_lea.vmem %s1930_s13, 4096  ;;  %p1932_p9 = scmp.lt.s32.totalorder %s2133_s16, %s1930_s13 }
  0x25   : > { %p1927_p5 = pnand %p1925_p2, %p1911_p3  ;;  %p1933_p4 = scmp.lt.s32.totalorder %s1931_s15, %s1924_s9 }
  0x27   : > { %p1928_p11 = pneg %p1927_p5  ;;  %p1934_p7 = por %p1933_p4, %p1932_p9 }
  0x29   : > { %p1935_p10 = pnand %p1934_p7, %p1928_p11 }
  0x2b   : > { %1938 = shalt.err (!%p1935_p10)
}
  0x2c   : > { %s2024_s25 = smov 256   ;;  %s2025_s27 = smov 16  }
  0x2d   : > { %1847 = dma.hbm_to_vmem [thread:$0]  (!%p2137_p0), %s2131_s14, 2048, %s2133_s16, %s2142_s24, %s2024_s25, %s2024_s25, %s2025_s27  }
  0x2e   : > { %p222_p12 = scmp.lt.s32.totalorder %s2021_s23, 3  ;;  %p2619_p1 = scmp.ge.s32.totalorder %s2021_s23, 1 }
  0x30   : > { %p223_p3 = pnand %p2619_p1, %p222_p12 }
  0x31   : > { %s2174_s29 = sand.u32 (!%p223_p3), 1, %s2005_s19  }
  0x32   : > { %226 = sbr.rel (%p223_p3) target bundleno = 823 (0x337), region = 40  ;;  %s1785_s28 = sshll.u32 (!%p223_p3), %s2174_s29, 7 }
  0x33   : > { %s229_s10 = scalar_lea.sflag (!%p223_p3), [#allocation4], %s2174_s29  ;;  %s2178_s11 = scalar_lea.vmem (!%p223_p3), [#allocation3], %s1785_s28 }
  0x39   : > { %1992 = dma.done.wait (%p2109_p8), %s229_s10, 2048  }
  0x3a   : > { %1994 = vsyncadd (%p2109_p8), %s229_s10, 4294965248  ;;  %v299_v0 = vlaneseq  ;;  %v2026_v1 = vmov 1983009808   ;;  %v2027_v3 = vmov 1934713408   ;;  %v2028_v5 = vmov 0.0  }
  0x3b   : > { %v297_v2 = vunpack.c.l.s4 %v2026_v1  ;;  %v328_v4 = vunpack.c.l.s4 %v2027_v3  ;;  %1823 = vmatprep.subr.mxu1 %v2028_v5  ;;  %v271_v10 = vld [vmem:[%s2178_s11] sm:$0xff]  ;;  %v272_v11 = vld [vmem:[%s2178_s11 + $0x8] sm:$0xff]  ;;  %vm823_vm0 = vcmask 1041408   ;;  %vm1336_vm1 = vcmask 1041409   ;;  %s1789_s15 = sshll.u32 %s2013_s21, 4  ;;  %s257_s25 = scalar_lea.vmem [#allocation6], %s2174_s29 }
  0x3c   : > { %v2186_v6 = vshrl.u32 %v299_v0, 7  ;;  %v275_v13 = vld [vmem:[%s2178_s11 + $0x20] sm:$0xff]  ;;  %v295_v14 = vcombine.high %v271_v10, %v2028_v5  ;;  %v310_v16 = vcombine.high %v272_v11, %v2028_v5  ;;  %v276_v18 = vld [vmem:[%s2178_s11 + $0x28] sm:$0xff]  ;;  %vm1338_vm2 = vcmask 1042434   ;;  %s1700_s27 = sshll.u32 %s257_s25, 4  ;;  %s1688_s30 = scalar_lea.sflag [#allocation5], %s2174_s29  ;;  %s2560_s27 = int_to_ptr.vmem [resolvable:$true] %s1700_s27 }
  0x3d   : > { %v298_v7 = vunpack.c.0.s8 %v297_v2  ;;  %v329_v8 = vunpack.c.0.s8 %v328_v4  ;;  %v427_v19 = vcombine.high %v275_v13, %v2028_v5  ;;  %v442_v21 = vcombine.high %v276_v18, %v2028_v5  ;;  %s1939_s14 = scalar_lea.vmem %s2560_s27, 16  ;;  %p2620_p9 = scmp.ne.s32.totalorder %s2616_s6, 0 }
  0x3e   : > { %vm1340_vm3 = vcmask 1043459   ;;  %vm1342_vm4 = vcmask 1044484   ;;  %vm1344_vm5 = vcmask 1045509   ;;  %vm1346_vm6 = vcmask 1046534   ;;  %p1940_p8 = scmp.ne.s32.totalorder %s2560_s27, %s1939_s14  ;;  %s2031_s21 = smov [#allocation6]  }
  0x3f   : > { %v2189_v9 = vsub.s32 %v298_v7, %v2186_v6  ;;  %v2194_v12 = vsub.s32 %v329_v8, %v2186_v6  ;;  %vm1348_vm7 = vcmask 1047559   ;;  %vm2030_vm8 = vmmov 0   ;;  %s1943_s16 = sshll.u32 %s2031_s21, 4  ;;  %s1944_s16 = int_to_ptr.vmem [resolvable:$false] %s1943_s16 }
  0x40   : > { %1820 = vmatprep.mubr.msk.f32.mxu0 %vm2030_vm8, %v2028_v5  ;;  %1825 = vmatprep.mubr.msk.f32.mxu1 %vm2030_vm8, %v2028_v5  ;;  %vm1486_vm9 = vcmask 130112   ;;  %vm1493_vm10 = vcmask 195712   ;;  %vm1500_vm11 = vcmask 261312   ;;  %vm1507_vm12 = vcmask 326912   ;;  %p1941_p11 = pnand %p1940_p8, %p2620_p9  ;;  %s1945_s17 = scalar_lea.vmem %s1944_s16, 32 }
  0x41   : > { %v302_v15 = vrot.slane %v271_v10, %v2189_v9  ;;  %v317_v17 = vrot.slane %v272_v11, %v2189_v9  ;;  %v434_v20 = vrot.slane %v275_v13, %v2189_v9  ;;  %v449_v22 = vrot.slane %v276_v18, %v2189_v9  ;;  %p1946_p6 = scmp.lt.s32.totalorder %s2560_s27, %s1944_s16  ;;  %p1947_p13 = scmp.lt.s32.totalorder %s1945_s17, %s1939_s14 }
  0x42   : > { %v309_v23 = vrot.slane %v295_v14, %v2189_v9  ;;  %v324_v24 = vrot.slane %v310_v16, %v2189_v9  ;;  %v441_v27 = vrot.slane %v427_v19, %v2189_v9  ;;  %v456_v28 = vrot.slane %v442_v21, %v2189_v9  ;;  %p1942_p0 = pneg %p1941_p11 }
  0x43   : > { %v325_v25 = vcombine.low %v302_v15, %v317_v17  ;;  %v326_v26 = vcombine.high %v302_v15, %v317_v17  ;;  %v457_v29 = vcombine.low %v434_v20, %v449_v22  ;;  %v458_v30 = vcombine.high %v434_v20, %v449_v22  ;;  %p1948_p2 = por %p1947_p13, %p1946_p6 }
  0x44   : > { %v341_v33 = vcombine.low %v309_v23, %v324_v24  ;;  %v342_v34 = vcombine.high %v309_v23, %v324_v24  ;;  %v473_v37 = vcombine.low %v441_v27, %v456_v28  ;;  %v474_v38 = vcombine.high %v441_v27, %v456_v28 }
  0x45   : > { %v333_v31 = vrot.slane %v325_v25, %v2194_v12  ;;  %v340_v32 = vrot.slane %v326_v26, %v2194_v12  ;;  %v2213_v35 = vrot.slane %v457_v29, %v2194_v12  ;;  %v2216_v36 = vrot.slane %v458_v30, %v2194_v12  ;;  %p1949_p5 = pnand %p1948_p2, %p1942_p0 }
  0x46   : > { %v349_v39 = vrot.slane %v341_v33, %v2194_v12  ;;  %v356_v40 = vrot.slane %v342_v34, %v2194_v12  ;;  %v2225_v45 = vrot.slane %v473_v37, %v2194_v12  ;;  %v2228_v46 = vrot.slane %v474_v38, %v2194_v12 }
  0x47   : > { %v357_v41 = vcombine.high %v333_v31, %v2028_v5  ;;  %v358_v42 = vcombine.high %v340_v32, %v2028_v5  ;;  %v824_v43 = vsel %vm823_vm0, %v333_v31, 0.0  ;;  %v838_v44 = vsel %vm823_vm0, %v340_v32, 0.0 }
  0x48   : > { %v359_v47 = vcombine.high %v349_v39, %v2028_v5  ;;  %v360_v48 = vcombine.high %v356_v40, %v2028_v5  ;;  %v825_v49 = vrot.slane %v824_v43, 4  ;;  %v839_v52 = vrot.slane %v838_v44, 4 }
  0x49   : > { %v831_v50 = vsel %vm823_vm0, %v357_v41, 0.0  ;;  %v845_v53 = vsel %vm823_vm0, %v358_v42, 0.0  ;;  %v852_v54 = vsel %vm823_vm0, %v349_v39, 0.0  ;;  %v866_v62 = vsel %vm823_vm0, %v356_v40, 0.0 }
  0x4a   : > { %v832_v51 = vrot.slane %v831_v50, 4  ;;  %v826_v55 = vadd.f32 %v825_v49, %v824_v43  ;;  %v846_v56 = vrot.slane %v845_v53, 4  ;;  %v853_v57 = vrot.slane %v852_v54, 4 }
  0x4b   : > { %v859_v58 = vsel %vm823_vm0, %v359_v47, 0.0  ;;  %v840_v60 = vadd.f32 %v839_v52, %v838_v44  ;;  %v867_v3 = vrot.slane %v866_v62, 4  ;;  %v873_v10 = vsel %vm823_vm0, %v360_v48, 0.0 }
  0x4c   : > { %v833_v59 = vadd.f32 %v832_v51, %v831_v50  ;;  %v860_v61 = vrot.slane %v859_v58, 4  ;;  %v827_v63 = vrot.slane %v826_v55, 2  ;;  %v847_v1 = vadd.f32 %v846_v56, %v845_v53 }
  0x4d   : > { %v854_v2 = vadd.f32 %v853_v57, %v852_v54  ;;  %v841_v7 = vrot.slane %v840_v60, 2  ;;  %v868_v15 = vadd.f32 %v867_v3, %v866_v62  ;;  %v874_v19 = vrot.slane %v873_v10, 4 }
  0x4e   : > { %v834_v4 = vrot.slane %v833_v59, 2  ;;  %v861_v8 = vadd.f32 %v860_v61, %v859_v58  ;;  %v828_v11 = vadd.f32 %v827_v63, %v826_v55  ;;  %v848_v13 = vrot.slane %v847_v1, 2 }
  0x4f   : > { %v855_v14 = vrot.slane %v854_v2, 2  ;;  %v842_v17 = vadd.f32 %v841_v7, %v840_v60  ;;  %v869_v23 = vrot.slane %v868_v15, 2  ;;  %v875_v27 = vadd.f32 %v874_v19, %v873_v10 }
  0x50   : > { %v835_v16 = vadd.f32 %v834_v4, %v833_v59  ;;  %v862_v18 = vrot.slane %v861_v8, 2  ;;  %v829_v20 = vrot.slane %v828_v11, 1  ;;  %v849_v21 = vadd.f32 %v848_v13, %v847_v1 }
  0x51   : > { %v856_v22 = vadd.f32 %v855_v14, %v854_v2  ;;  %v843_v25 = vrot.slane %v842_v17, 1  ;;  %v870_v31 = vadd.f32 %v869_v23, %v868_v15  ;;  %v876_v37 = vrot.slane %v875_v27, 2 }
  0x52   : > { %v836_v24 = vrot.slane %v835_v16, 1  ;;  %v863_v26 = vadd.f32 %v862_v18, %v861_v8  ;;  %v830_v28 = vadd.f32 %v829_v20, %v828_v11  ;;  %v850_v29 = vrot.slane %v849_v21, 1 }
  0x53   : > { %v857_v30 = vrot.slane %v856_v22, 1  ;;  %v844_v33 = vadd.f32 %v843_v25, %v842_v17  ;;  %v871_v40 = vrot.slane %v870_v31, 1  ;;  %v489_v41 = vcombine.high %v2213_v35, %v2028_v5 }
  0x54   : > { %v837_v32 = vadd.f32 %v836_v24, %v835_v16  ;;  %v864_v34 = vrot.slane %v863_v26, 1  ;;  %v851_v38 = vadd.f32 %v850_v29, %v849_v21  ;;  %v877_v43 = vadd.f32 %v876_v37, %v875_v27 }
  0x55   : > { %v858_v39 = vadd.f32 %v857_v30, %v856_v22  ;;  %v490_v47 = vcombine.high %v2216_v36, %v2028_v5  ;;  %v872_v48 = vadd.f32 %v871_v40, %v870_v31  ;;  %v491_v50 = vcombine.high %v2225_v45, %v2028_v5 }
  0x56   : > { %v865_v42 = vadd.f32 %v864_v34, %v863_v26  ;;  %v1337_v44 = vsel %vm1336_vm1, %v837_v32, %v830_v28  ;;  %v492_v51 = vcombine.high %v2228_v46, %v2028_v5  ;;  %v878_v52 = vrot.slane %v877_v43, 1 }
  0x57   : > { %v1339_v49 = vsel %vm1338_vm2, %v844_v33, %v1337_v44  ;;  %v936_v54 = vsel %vm823_vm0, %v2213_v35, 0.0  ;;  %v943_v55 = vsel %vm823_vm0, %v489_v41, 0.0  ;;  %v950_v59 = vsel %vm823_vm0, %v2216_v36, 0.0 }
  0x58   : > { %v1341_v53 = vsel %vm1340_vm3, %v851_v38, %v1339_v49  ;;  %v937_v57 = vrot.slane %v936_v54, 4  ;;  %v944_v58 = vrot.slane %v943_v55, 4  ;;  %v879_v60 = vadd.f32 %v878_v52, %v877_v43  ;;  %v273_v43 = vld [vmem:[%s2178_s11 + $0x10] sm:$0xff] }
  0x59   : > { %v1343_v56 = vsel %vm1342_vm4, %v858_v39, %v1341_v53  ;;  %v951_v62 = vrot.slane %v950_v59, 4  ;;  %v957_v63 = vsel %vm823_vm0, %v490_v47, 0.0  ;;  %v964_v8 = vsel %vm823_vm0, %v2225_v45, 0.0 }
  0x5a   : > { %v1345_v61 = vsel %vm1344_vm5, %v865_v42, %v1343_v56  ;;  %v938_v2 = vadd.f32 %v937_v57, %v936_v54  ;;  %v945_v3 = vadd.f32 %v944_v58, %v943_v55  ;;  %v958_v35 = vrot.slane %v957_v63, 4  ;;  %v274_v54 = vld [vmem:[%s2178_s11 + $0x18] sm:$0xff]  ;;  %v277_v55 = vld [vmem:[%s2178_s11 + $0x30] sm:$0xff] }
  0x5b   : > { %v1347_v1 = vsel %vm1346_vm6, %v872_v48, %v1345_v61  ;;  %v952_v7 = vadd.f32 %v951_v62, %v950_v59  ;;  %v971_v10 = vsel %vm823_vm0, %v491_v50, 0.0  ;;  %v965_v14 = vrot.slane %v964_v8, 4 }
  0x5c   : > { %v1349_v4 = vsel %vm1348_vm7, %v879_v60, %v1347_v1  ;;  %v939_v36 = vrot.slane %v938_v2, 2  ;;  %v946_v11 = vrot.slane %v945_v3, 2  ;;  %v959_v13 = vadd.f32 %v958_v35, %v957_v63 }
  0x5d   : > { %1434 = vadd.xlane.f32.xlu0 %v1349_v4  ;;  %v953_v15 = vrot.slane %v952_v7, 2  ;;  %v972_v16 = vrot.slane %v971_v10, 4  ;;  %v978_v17 = vsel %vm823_vm0, %v2228_v46, 0.0  ;;  %v985_v18 = vsel %vm823_vm0, %v492_v51, 0.0 }
  0x5e   : > { %v940_v19 = vadd.f32 %v939_v36, %v938_v2  ;;  %v947_v20 = vadd.f32 %v946_v11, %v945_v3  ;;  %v960_v21 = vrot.slane %v959_v13, 2  ;;  %v966_v22 = vadd.f32 %v965_v14, %v964_v8  ;;  %v278_v3 = vld [vmem:[%s2178_s11 + $0x38] sm:$0xff] }
  0x5f   : > { %v954_v23 = vadd.f32 %v953_v15, %v952_v7  ;;  %v973_v45 = vadd.f32 %v972_v16, %v971_v10  ;;  %v979_v24 = vrot.slane %v978_v17, 4  ;;  %v986_v25 = vrot.slane %v985_v18, 4 }
  0x60   : > { %v941_v26 = vrot.slane %v940_v19, 1  ;;  %v948_v27 = vrot.slane %v947_v20, 1  ;;  %v961_v28 = vadd.f32 %v960_v21, %v959_v13  ;;  %v967_v29 = vrot.slane %v966_v22, 2 }
  0x61   : > { %v955_v30 = vrot.slane %v954_v23, 1  ;;  %v974_v31 = vrot.slane %v973_v45, 2  ;;  %v980_v32 = vadd.f32 %v979_v24, %v978_v17  ;;  %v987_v33 = vadd.f32 %v986_v25, %v985_v18 }
  0x62   : > { %v942_v46 = vadd.f32 %v941_v26, %v940_v19  ;;  %v949_v34 = vadd.f32 %v948_v27, %v947_v20  ;;  %v962_v37 = vrot.slane %v961_v28, 1  ;;  %v968_v38 = vadd.f32 %v967_v29, %v966_v22 }
  0x63   : > { %v956_v39 = vadd.f32 %v955_v30, %v954_v23  ;;  %v975_v40 = vadd.f32 %v974_v31, %v973_v45  ;;  %v981_v41 = vrot.slane %v980_v32, 2  ;;  %v988_v42 = vrot.slane %v987_v33, 2 }
  0x64   : > { %v963_v44 = vadd.f32 %v962_v37, %v961_v28  ;;  %v969_v47 = vrot.slane %v968_v38, 1  ;;  %v1357_v48 = vsel %vm1336_vm1, %v949_v34, %v942_v46  ;;  %v361_v49 = vcombine.high %v273_v43, %v2028_v5 }
  0x65   : > { %v976_v50 = vrot.slane %v975_v40, 1  ;;  %v982_v51 = vadd.f32 %v981_v41, %v980_v32  ;;  %v989_v52 = vadd.f32 %v988_v42, %v987_v33  ;;  %v1358_v53 = vsel %vm1338_vm2, %v956_v39, %v1357_v48 }
  0x66   : > { %v970_v56 = vadd.f32 %v969_v47, %v968_v38  ;;  %v1359_v57 = vsel %vm1340_vm3, %v963_v44, %v1358_v53  ;;  %v368_v58 = vrot.slane %v273_v43, %v2189_v9  ;;  %v375_v59 = vrot.slane %v361_v49, %v2189_v9 }
  0x67   : > { %v977_v60 = vadd.f32 %v976_v50, %v975_v40  ;;  %v983_v61 = vrot.slane %v982_v51, 1  ;;  %v990_v62 = vrot.slane %v989_v52, 1  ;;  %v376_v63 = vcombine.high %v274_v54, %v2028_v5 }
  0x68   : > { %v1360_v1 = vsel %vm1342_vm4, %v970_v56, %v1359_v57  ;;  %v383_v2 = vrot.slane %v274_v54, %v2189_v9  ;;  %v493_v35 = vcombine.high %v277_v55, %v2028_v5  ;;  %v2280_v4 = vrot.slane %v277_v55, %v2189_v9 }
  0x69   : > { %v984_v7 = vadd.f32 %v983_v61, %v982_v51  ;;  %v991_v8 = vadd.f32 %v990_v62, %v989_v52  ;;  %v1361_v10 = vsel %vm1344_vm5, %v977_v60, %v1360_v1  ;;  %v390_v36 = vrot.slane %v376_v63, %v2189_v9 }
  0x6a   : > { %v391_v11 = vcombine.low %v368_v58, %v383_v2  ;;  %v392_v13 = vcombine.high %v368_v58, %v383_v2  ;;  %v2285_v14 = vrot.slane %v493_v35, %v2189_v9  ;;  %v508_v15 = vcombine.high %v278_v3, %v2028_v5 }
  0x6b   : > { %v1362_v16 = vsel %vm1346_vm6, %v984_v7, %v1361_v10  ;;  %v407_v17 = vcombine.low %v375_v59, %v390_v36  ;;  %v408_v18 = vcombine.high %v375_v59, %v390_v36  ;;  %v2290_v19 = vrot.slane %v278_v3, %v2189_v9 }
  0x6c   : > { %v1363_v20 = vsel %vm1348_vm7, %v991_v8, %v1362_v16  ;;  %v399_v21 = vrot.slane %v391_v11, %v2194_v12  ;;  %v406_v22 = vrot.slane %v392_v13, %v2194_v12  ;;  %v2296_v23 = vrot.slane %v508_v15, %v2189_v9 }
  0x6d   : > { %1438 = vadd.xlane.f32.xlu1 %v1363_v20  ;;  %v415_v45 = vrot.slane %v407_v17, %v2194_v12  ;;  %v422_v24 = vrot.slane %v408_v18, %v2194_v12  ;;  %v523_v25 = vcombine.low %v2280_v4, %v2290_v19  ;;  %v524_v26 = vcombine.high %v2280_v4, %v2290_v19 }
  0x6e   : > { %v423_v27 = vcombine.high %v399_v21, %v2028_v5  ;;  %v424_v28 = vcombine.high %v406_v22, %v2028_v5  ;;  %v880_v29 = vsel %vm823_vm0, %v399_v21, 0.0  ;;  %v894_v30 = vsel %vm823_vm0, %v406_v22, 0.0 }
  0x6f   : > { %v425_v31 = vcombine.high %v415_v45, %v2028_v5  ;;  %v426_v32 = vcombine.high %v422_v24, %v2028_v5  ;;  %v881_v33 = vrot.slane %v880_v29, 4  ;;  %v895_v46 = vrot.slane %v894_v30, 4 }
  0x70   : > { %v887_v34 = vsel %vm823_vm0, %v423_v27, 0.0  ;;  %v901_v37 = vsel %vm823_vm0, %v424_v28, 0.0  ;;  %v908_v38 = vsel %vm823_vm0, %v415_v45, 0.0  ;;  %v922_v39 = vsel %vm823_vm0, %v422_v24, 0.0 }
  0x71   : > { %v882_v40 = vadd.f32 %v881_v33, %v880_v29  ;;  %v888_v41 = vrot.slane %v887_v34, 4  ;;  %v896_v42 = vadd.f32 %v895_v46, %v894_v30  ;;  %v902_v43 = vrot.slane %v901_v37, 4 }
  0x72   : > { %v909_v44 = vrot.slane %v908_v38, 4  ;;  %v915_v47 = vsel %vm823_vm0, %v425_v31, 0.0  ;;  %v923_v48 = vrot.slane %v922_v39, 4  ;;  %v929_v49 = vsel %vm823_vm0, %v426_v32, 0.0 }
  0x73   : > { %v883_v50 = vrot.slane %v882_v40, 2  ;;  %v889_v51 = vadd.f32 %v888_v41, %v887_v34  ;;  %v897_v52 = vrot.slane %v896_v42, 2  ;;  %v903_v53 = vadd.f32 %v902_v43, %v901_v37 }
  0x74   : > { %v910_v54 = vadd.f32 %v909_v44, %v908_v38  ;;  %v916_v55 = vrot.slane %v915_v47, 4  ;;  %v924_v56 = vadd.f32 %v923_v48, %v922_v39  ;;  %v930_v57 = vrot.slane %v929_v49, 4 }
  0x75   : > { %v884_v58 = vadd.f32 %v883_v50, %v882_v40  ;;  %v890_v59 = vrot.slane %v889_v51, 2  ;;  %v898_v60 = vadd.f32 %v897_v52, %v896_v42  ;;  %v904_v61 = vrot.slane %v903_v53, 2 }
  0x76   : > { %v911_v62 = vrot.slane %v910_v54, 2  ;;  %v917_v63 = vadd.f32 %v916_v55, %v915_v47  ;;  %v925_v1 = vrot.slane %v924_v56, 2  ;;  %v931_v2 = vadd.f32 %v930_v57, %v929_v49 }
  0x77   : > { %v885_v3 = vrot.slane %v884_v58, 1  ;;  %v891_v35 = vadd.f32 %v890_v59, %v889_v51  ;;  %v899_v4 = vrot.slane %v898_v60, 1  ;;  %v905_v7 = vadd.f32 %v904_v61, %v903_v53 }
  0x78   : > { %v912_v8 = vadd.f32 %v911_v62, %v910_v54  ;;  %v918_v10 = vrot.slane %v917_v63, 2  ;;  %v926_v36 = vadd.f32 %v925_v1, %v924_v56  ;;  %v932_v11 = vrot.slane %v931_v2, 2 }
  0x79   : > { %v886_v13 = vadd.f32 %v885_v3, %v884_v58  ;;  %v892_v15 = vrot.slane %v891_v35, 1  ;;  %v900_v16 = vadd.f32 %v899_v4, %v898_v60  ;;  %v906_v17 = vrot.slane %v905_v7, 1 }
  0x7a   : > { %v913_v18 = vrot.slane %v912_v8, 1  ;;  %v919_v19 = vadd.f32 %v918_v10, %v917_v63  ;;  %v927_v20 = vrot.slane %v926_v36, 1  ;;  %v933_v21 = vadd.f32 %v932_v11, %v931_v2 }
  0x7b   : > { %v893_v22 = vadd.f32 %v892_v15, %v891_v35  ;;  %v907_v45 = vadd.f32 %v906_v17, %v905_v7  ;;  %v531_v24 = vrot.slane %v523_v25, %v2194_v12  ;;  %v538_v27 = vrot.slane %v524_v26, %v2194_v12 }
  0x7c   : > { %v914_v28 = vadd.f32 %v913_v18, %v912_v8  ;;  %v920_v29 = vrot.slane %v919_v19, 1  ;;  %v928_v30 = vadd.f32 %v927_v20, %v926_v36  ;;  %v934_v31 = vrot.slane %v933_v21, 1 }
  0x7d   : > { %v1350_v32 = vsel %vm1336_vm1, %v893_v22, %v886_v13  ;;  %v539_v33 = vcombine.low %v2285_v14, %v2296_v23  ;;  %v540_v46 = vcombine.high %v2285_v14, %v2296_v23  ;;  %v555_v34 = vcombine.high %v531_v24, %v2028_v5 }
  0x7e   : > { %v921_v37 = vadd.f32 %v920_v29, %v919_v19  ;;  %v935_v38 = vadd.f32 %v934_v31, %v933_v21  ;;  %v1351_v25 = vsel %vm1338_vm2, %v900_v16, %v1350_v32  ;;  %v556_v26 = vcombine.high %v538_v27, %v2028_v5 }
  0x7f   : > { %v1352_v39 = vsel %vm1340_vm3, %v907_v45, %v1351_v25  ;;  %v547_v40 = vrot.slane %v539_v33, %v2194_v12  ;;  %v554_v41 = vrot.slane %v540_v46, %v2194_v12  ;;  %v992_v42 = vsel %vm823_vm0, %v531_v24, 0.0  ;;  %v279_v33 = vld [vmem:[%s2178_s11 + $0x40] sm:$0xff] }
  0x80   : > { %v1353_v43 = vsel %vm1342_vm4, %v914_v28, %v1352_v39  ;;  %v993_v44 = vrot.slane %v992_v42, 4  ;;  %v999_v14 = vsel %vm823_vm0, %v555_v34, 0.0  ;;  %v1006_v23 = vsel %vm823_vm0, %v538_v27, 0.0 }
  0x81   : > { %v1354_v47 = vsel %vm1344_vm5, %v921_v37, %v1353_v43  ;;  %v557_v48 = vcombine.high %v547_v40, %v2028_v5  ;;  %v558_v49 = vcombine.high %v554_v41, %v2028_v5  ;;  %v1000_v50 = vrot.slane %v999_v14, 4 }
  0x82   : > { %v1355_v51 = vsel %vm1346_vm6, %v928_v30, %v1354_v47  ;;  %v994_v52 = vadd.f32 %v993_v44, %v992_v42  ;;  %v1007_v53 = vrot.slane %v1006_v23, 4  ;;  %v1013_v54 = vsel %vm823_vm0, %v556_v26, 0.0 }
  0x83   : > { %v1356_v55 = vsel %vm1348_vm7, %v935_v38, %v1355_v51  ;;  %v1001_v56 = vadd.f32 %v1000_v50, %v999_v14  ;;  %v1014_v57 = vrot.slane %v1013_v54, 4  ;;  %v1020_v58 = vsel %vm823_vm0, %v547_v40, 0.0 }
  0x84   : > { %1436 = vadd.xlane.f32.xlu0 %v1356_v55  ;;  %v995_v59 = vrot.slane %v994_v52, 2  ;;  %v1008_v60 = vadd.f32 %v1007_v53, %v1006_v23  ;;  %v1021_v61 = vrot.slane %v1020_v58, 4  ;;  %v1027_v62 = vsel %vm823_vm0, %v557_v48, 0.0  ;;  %v281_v23 = vld [vmem:[%s2178_s11 + $0x50] sm:$0xff]  ;;  %v282_v55 = vld [vmem:[%s2178_s11 + $0x58] sm:$0xff] }
  0x85   : > { %v1002_v63 = vrot.slane %v1001_v56, 2  ;;  %v1015_v1 = vadd.f32 %v1014_v57, %v1013_v54  ;;  %v1028_v2 = vrot.slane %v1027_v62, 4  ;;  %v1034_v3 = vsel %vm823_vm0, %v554_v41, 0.0  ;;  %v280_v41 = vld [vmem:[%s2178_s11 + $0x48] sm:$0xff] }
  0x86   : > { %v996_v35 = vadd.f32 %v995_v59, %v994_v52  ;;  %v1009_v4 = vrot.slane %v1008_v60, 2  ;;  %v1022_v7 = vadd.f32 %v1021_v61, %v1020_v58  ;;  %v1035_v8 = vrot.slane %v1034_v3, 4 }
  0x87   : > { %v1003_v10 = vadd.f32 %v1002_v63, %v1001_v56  ;;  %v1016_v36 = vrot.slane %v1015_v1, 2  ;;  %v1029_v11 = vadd.f32 %v1028_v2, %v1027_v62  ;;  %v1041_v13 = vsel %vm823_vm0, %v558_v49, 0.0 }
  0x88   : > { %v997_v15 = vrot.slane %v996_v35, 1  ;;  %v1010_v16 = vadd.f32 %v1009_v4, %v1008_v60  ;;  %v1023_v17 = vrot.slane %v1022_v7, 2  ;;  %v1036_v18 = vadd.f32 %v1035_v8, %v1034_v3 }
  0x89   : > { %v1004_v19 = vrot.slane %v1003_v10, 1  ;;  %v1017_v20 = vadd.f32 %v1016_v36, %v1015_v1  ;;  %v1030_v21 = vrot.slane %v1029_v11, 2  ;;  %v1042_v22 = vrot.slane %v1041_v13, 4 }
  0x8a   : > { %v998_v45 = vadd.f32 %v997_v15, %v996_v35  ;;  %v1011_v24 = vrot.slane %v1010_v16, 1  ;;  %v1024_v27 = vadd.f32 %v1023_v17, %v1022_v7  ;;  %v1037_v28 = vrot.slane %v1036_v18, 2 }
  0x8b   : > { %v1005_v29 = vadd.f32 %v1004_v19, %v1003_v10  ;;  %v1018_v30 = vrot.slane %v1017_v20, 1  ;;  %v1031_v31 = vadd.f32 %v1030_v21, %v1029_v11  ;;  %v1043_v32 = vadd.f32 %v1042_v22, %v1041_v13 }
  0x8c   : > { %v1012_v46 = vadd.f32 %v1011_v24, %v1010_v16  ;;  %v1025_v34 = vrot.slane %v1024_v27, 1  ;;  %v1038_v37 = vadd.f32 %v1037_v28, %v1036_v18  ;;  %v559_v38 = vcombine.high %v279_v33, %v2028_v5 }
  0x8d   : > { %v1019_v25 = vadd.f32 %v1018_v30, %v1017_v20  ;;  %v1032_v26 = vrot.slane %v1031_v31, 1  ;;  %v1044_v39 = vrot.slane %v1043_v32, 2  ;;  %v1364_v40 = vsel %vm1336_vm1, %v1005_v29, %v998_v45 }
  0x8e   : > { %v1026_v42 = vadd.f32 %v1025_v34, %v1024_v27  ;;  %v1039_v43 = vrot.slane %v1038_v37, 1  ;;  %v1365_v44 = vsel %vm1338_vm2, %v1012_v46, %v1364_v40  ;;  %v566_v14 = vrot.slane %v279_v33, %v2189_v9 }
  0x8f   : > { %v1033_v47 = vadd.f32 %v1032_v26, %v1031_v31  ;;  %v1045_v48 = vadd.f32 %v1044_v39, %v1043_v32  ;;  %v1366_v49 = vsel %vm1340_vm3, %v1019_v25, %v1365_v44  ;;  %v573_v50 = vrot.slane %v559_v38, %v2189_v9 }
  0x90   : > { %v1040_v51 = vadd.f32 %v1039_v43, %v1038_v37  ;;  %v1367_v52 = vsel %vm1342_vm4, %v1026_v42, %v1366_v49  ;;  %v574_v53 = vcombine.high %v280_v41, %v2028_v5  ;;  %v581_v54 = vrot.slane %v280_v41, %v2189_v9 }
  0x91   : > { %v1046_v56 = vrot.slane %v1045_v48, 1  ;;  %v1368_v57 = vsel %vm1344_vm5, %v1033_v47, %v1367_v52  ;;  %v625_v58 = vcombine.high %v281_v23, %v2028_v5  ;;  %v632_v59 = vrot.slane %v281_v23, %v2189_v9 }
  0x92   : > { %v1369_v60 = vsel %vm1346_vm6, %v1040_v51, %v1368_v57  ;;  %v588_v61 = vrot.slane %v574_v53, %v2189_v9  ;;  %v589_v62 = vcombine.low %v566_v14, %v581_v54  ;;  %v590_v63 = vcombine.high %v566_v14, %v581_v54 }
  0x93   : > { %v1047_v1 = vadd.f32 %v1046_v56, %v1045_v48  ;;  %v2362_v2 = vrot.slane %v625_v58, %v2189_v9  ;;  %v640_v3 = vcombine.high %v282_v55, %v2028_v5  ;;  %v647_v35 = vrot.slane %v282_v55, %v2189_v9 }
  0x94   : > { %v597_v4 = vrot.slane %v589_v62, %v2194_v12  ;;  %v604_v7 = vrot.slane %v590_v63, %v2194_v12  ;;  %v605_v8 = vcombine.low %v573_v50, %v588_v61  ;;  %v606_v10 = vcombine.high %v573_v50, %v588_v61 }
  0x95   : > { %v1370_v36 = vsel %vm1348_vm7, %v1047_v1, %v1369_v60  ;;  %v2370_v11 = vrot.slane %v640_v3, %v2189_v9  ;;  %v655_v13 = vcombine.low %v632_v59, %v647_v35  ;;  %v656_v15 = vcombine.high %v632_v59, %v647_v35 }
  0x96   : > { %1440 = vadd.xlane.f32.xlu1 %v1370_v36  ;;  %v613_v16 = vrot.slane %v605_v8, %v2194_v12  ;;  %v620_v17 = vrot.slane %v606_v10, %v2194_v12  ;;  %v621_v18 = vcombine.high %v597_v4, %v2028_v5  ;;  %v622_v19 = vcombine.high %v604_v7, %v2028_v5 }
  0x97   : > { %v1048_v20 = vsel %vm823_vm0, %v597_v4, 0.0  ;;  %v1062_v21 = vsel %vm823_vm0, %v604_v7, 0.0  ;;  %v2379_v22 = vrot.slane %v655_v13, %v2194_v12  ;;  %v2382_v45 = vrot.slane %v656_v15, %v2194_v12 }
  0x98   : > { %v623_v24 = vcombine.high %v613_v16, %v2028_v5  ;;  %v624_v27 = vcombine.high %v620_v17, %v2028_v5  ;;  %v1049_v28 = vrot.slane %v1048_v20, 4  ;;  %v1055_v29 = vsel %vm823_vm0, %v621_v18, 0.0 }
  0x99   : > { %v1056_v30 = vrot.slane %v1055_v29, 4  ;;  %v1063_v31 = vrot.slane %v1062_v21, 4  ;;  %v1069_v32 = vsel %vm823_vm0, %v622_v19, 0.0  ;;  %v1076_v33 = vsel %vm823_vm0, %v613_v16, 0.0 }
  0x9a   : > { %v1050_v46 = vadd.f32 %v1049_v28, %v1048_v20  ;;  %v1070_v34 = vrot.slane %v1069_v32, 4  ;;  %v1077_v37 = vrot.slane %v1076_v33, 4  ;;  %v1083_v38 = vsel %vm823_vm0, %v623_v24, 0.0 }
  0x9b   : > { %v1057_v25 = vadd.f32 %v1056_v30, %v1055_v29  ;;  %v1064_v26 = vadd.f32 %v1063_v31, %v1062_v21  ;;  %v1084_v39 = vrot.slane %v1083_v38, 4  ;;  %v1090_v40 = vsel %vm823_vm0, %v620_v17, 0.0 }
  0x9c   : > { %v1051_v41 = vrot.slane %v1050_v46, 2  ;;  %v1071_v42 = vadd.f32 %v1070_v34, %v1069_v32  ;;  %v1078_v43 = vadd.f32 %v1077_v37, %v1076_v33  ;;  %v1091_v44 = vrot.slane %v1090_v40, 4 }
  0x9d   : > { %v1058_v14 = vrot.slane %v1057_v25, 2  ;;  %v1065_v23 = vrot.slane %v1064_v26, 2  ;;  %v1085_v47 = vadd.f32 %v1084_v39, %v1083_v38  ;;  %v1097_v48 = vsel %vm823_vm0, %v624_v27, 0.0 }
  0x9e   : > { %v1052_v49 = vadd.f32 %v1051_v41, %v1050_v46  ;;  %v1072_v50 = vrot.slane %v1071_v42, 2  ;;  %v1079_v51 = vrot.slane %v1078_v43, 2  ;;  %v1092_v52 = vadd.f32 %v1091_v44, %v1090_v40 }
  0x9f   : > { %v1059_v53 = vadd.f32 %v1058_v14, %v1057_v25  ;;  %v1066_v54 = vadd.f32 %v1065_v23, %v1064_v26  ;;  %v1086_v55 = vrot.slane %v1085_v47, 2  ;;  %v1098_v56 = vrot.slane %v1097_v48, 4 }
  0xa0   : > { %v1053_v57 = vrot.slane %v1052_v49, 1  ;;  %v1073_v58 = vadd.f32 %v1072_v50, %v1071_v42  ;;  %v1080_v59 = vadd.f32 %v1079_v51, %v1078_v43  ;;  %v1093_v60 = vrot.slane %v1092_v52, 2 }
  0xa1   : > { %v1060_v61 = vrot.slane %v1059_v53, 1  ;;  %v1067_v62 = vrot.slane %v1066_v54, 1  ;;  %v1087_v63 = vadd.f32 %v1086_v55, %v1085_v47  ;;  %v1099_v1 = vadd.f32 %v1098_v56, %v1097_v48 }
  0xa2   : > { %v1054_v3 = vadd.f32 %v1053_v57, %v1052_v49  ;;  %v1074_v35 = vrot.slane %v1073_v58, 1  ;;  %v1081_v4 = vrot.slane %v1080_v59, 1  ;;  %v1094_v7 = vadd.f32 %v1093_v60, %v1092_v52 }
  0xa3   : > { %v1061_v8 = vadd.f32 %v1060_v61, %v1059_v53  ;;  %v1068_v10 = vadd.f32 %v1067_v62, %v1066_v54  ;;  %v1088_v36 = vrot.slane %v1087_v63, 1  ;;  %v1100_v13 = vrot.slane %v1099_v1, 2 }
  0xa4   : > { %v1075_v15 = vadd.f32 %v1074_v35, %v1073_v58  ;;  %v1082_v16 = vadd.f32 %v1081_v4, %v1080_v59  ;;  %v1095_v17 = vrot.slane %v1094_v7, 1  ;;  %v671_v18 = vcombine.low %v2362_v2, %v2370_v11 }
  0xa5   : > { %v1089_v19 = vadd.f32 %v1088_v36, %v1087_v63  ;;  %v1101_v20 = vadd.f32 %v1100_v13, %v1099_v1  ;;  %v1371_v21 = vsel %vm1336_vm1, %v1061_v8, %v1054_v3  ;;  %v672_v24 = vcombine.high %v2362_v2, %v2370_v11 }
  0xa6   : > { %v1096_v27 = vadd.f32 %v1095_v17, %v1094_v7  ;;  %v1372_v28 = vsel %vm1338_vm2, %v1068_v10, %v1371_v21  ;;  %v679_v29 = vrot.slane %v671_v18, %v2194_v12  ;;  %v687_v30 = vcombine.high %v2379_v22, %v2028_v5 }
  0xa7   : > { %v1102_v31 = vrot.slane %v1101_v20, 1  ;;  %v1373_v32 = vsel %vm1340_vm3, %v1075_v15, %v1372_v28  ;;  %v686_v33 = vrot.slane %v672_v24, %v2194_v12  ;;  %v688_v46 = vcombine.high %v2382_v45, %v2028_v5  ;;  %v283_v28 = vld [vmem:[%s2178_s11 + $0x60] sm:$0xff] }
  0xa8   : > { %v1374_v34 = vsel %vm1342_vm4, %v1082_v16, %v1373_v32  ;;  %v689_v2 = vcombine.high %v679_v29, %v2028_v5  ;;  %v1104_v11 = vsel %vm823_vm0, %v2379_v22, 0.0  ;;  %v1111_v37 = vsel %vm823_vm0, %v687_v30, 0.0 }
  0xa9   : > { %v1103_v38 = vadd.f32 %v1102_v31, %v1101_v20  ;;  %v1375_v25 = vsel %vm1344_vm5, %v1089_v19, %v1374_v34  ;;  %v690_v26 = vcombine.high %v686_v33, %v2028_v5  ;;  %v1105_v39 = vrot.slane %v1104_v11, 4 }
  0xaa   : > { %v1376_v40 = vsel %vm1346_vm6, %v1096_v27, %v1375_v25  ;;  %v1112_v41 = vrot.slane %v1111_v37, 4  ;;  %v1118_v42 = vsel %vm823_vm0, %v2382_v45, 0.0  ;;  %v1125_v43 = vsel %vm823_vm0, %v688_v46, 0.0 }
  0xab   : > { %v1377_v44 = vsel %vm1348_vm7, %v1103_v38, %v1376_v40  ;;  %v1106_v14 = vadd.f32 %v1105_v39, %v1104_v11  ;;  %v1119_v22 = vrot.slane %v1118_v42, 4  ;;  %v1126_v23 = vrot.slane %v1125_v43, 4  ;;  %v284_v11 = vld [vmem:[%s2178_s11 + $0x68] sm:$0xff]  ;;  %v285_v39 = vld [vmem:[%s2178_s11 + $0x70] sm:$0xff] }
  0xac   : > { %1442 = vadd.xlane.f32.xlu0 %v1377_v44  ;;  %v1113_v47 = vadd.f32 %v1112_v41, %v1111_v37  ;;  %v1132_v48 = vsel %vm823_vm0, %v679_v29, 0.0  ;;  %v1139_v49 = vsel %vm823_vm0, %v689_v2, 0.0  ;;  %v1146_v50 = vsel %vm823_vm0, %v686_v33, 0.0 }
  0xad   : > { %v1107_v51 = vrot.slane %v1106_v14, 2  ;;  %v1120_v52 = vadd.f32 %v1119_v22, %v1118_v42  ;;  %v1127_v53 = vadd.f32 %v1126_v23, %v1125_v43  ;;  %v1133_v54 = vrot.slane %v1132_v48, 4  ;;  %v286_v23 = vld [vmem:[%s2178_s11 + $0x78] sm:$0xff]  ;;  %s2558_s11 = scalar_lea.hbm %s2612_s5, %s1789_s15 }
  0xae   : > { %v1114_v45 = vrot.slane %v1113_v47, 2  ;;  %v1140_v55 = vrot.slane %v1139_v49, 4  ;;  %v1147_v56 = vrot.slane %v1146_v50, 4  ;;  %v1153_v57 = vsel %vm823_vm0, %v690_v26, 0.0 }
  0xaf   : > { %v1108_v58 = vadd.f32 %v1107_v51, %v1106_v14  ;;  %v1121_v59 = vrot.slane %v1120_v52, 2  ;;  %v1128_v60 = vrot.slane %v1127_v53, 2  ;;  %v1134_v61 = vadd.f32 %v1133_v54, %v1132_v48 }
  0xb0   : > { %v1115_v62 = vadd.f32 %v1114_v45, %v1113_v47  ;;  %v1141_v63 = vadd.f32 %v1140_v55, %v1139_v49  ;;  %v1148_v1 = vadd.f32 %v1147_v56, %v1146_v50  ;;  %v1154_v3 = vrot.slane %v1153_v57, 4 }
  0xb1   : > { %v1109_v35 = vrot.slane %v1108_v58, 1  ;;  %v1122_v4 = vadd.f32 %v1121_v59, %v1120_v52  ;;  %v1129_v7 = vadd.f32 %v1128_v60, %v1127_v53  ;;  %v1135_v8 = vrot.slane %v1134_v61, 2 }
  0xb2   : > { %v1116_v10 = vrot.slane %v1115_v62, 1  ;;  %v1142_v36 = vrot.slane %v1141_v63, 2  ;;  %v1149_v13 = vrot.slane %v1148_v1, 2  ;;  %v1155_v15 = vadd.f32 %v1154_v3, %v1153_v57 }
  0xb3   : > { %v1110_v16 = vadd.f32 %v1109_v35, %v1108_v58  ;;  %v1123_v17 = vrot.slane %v1122_v4, 1  ;;  %v1130_v18 = vrot.slane %v1129_v7, 1  ;;  %v1136_v19 = vadd.f32 %v1135_v8, %v1134_v61 }
  0xb4   : > { %v1117_v20 = vadd.f32 %v1116_v10, %v1115_v62  ;;  %v1143_v21 = vadd.f32 %v1142_v36, %v1141_v63  ;;  %v1150_v24 = vadd.f32 %v1149_v13, %v1148_v1  ;;  %v1156_v27 = vrot.slane %v1155_v15, 2 }
  0xb5   : > { %v1124_v29 = vadd.f32 %v1123_v17, %v1122_v4  ;;  %v1131_v30 = vadd.f32 %v1130_v18, %v1129_v7  ;;  %v1137_v31 = vrot.slane %v1136_v19, 1  ;;  %v691_v32 = vcombine.high %v283_v28, %v2028_v5 }
  0xb6   : > { %v1144_v33 = vrot.slane %v1143_v21, 1  ;;  %v1151_v46 = vrot.slane %v1150_v24, 1  ;;  %v1157_v34 = vadd.f32 %v1156_v27, %v1155_v15  ;;  %v1378_v2 = vsel %vm1336_vm1, %v1117_v20, %v1110_v16 }
  0xb7   : > { %v1138_v37 = vadd.f32 %v1137_v31, %v1136_v19  ;;  %v1379_v38 = vsel %vm1338_vm2, %v1124_v29, %v1378_v2  ;;  %v698_v25 = vrot.slane %v283_v28, %v2189_v9  ;;  %v705_v26 = vrot.slane %v691_v32, %v2189_v9 }
  0xb8   : > { %v1145_v40 = vadd.f32 %v1144_v33, %v1143_v21  ;;  %v1152_v41 = vadd.f32 %v1151_v46, %v1150_v24  ;;  %v1158_v42 = vrot.slane %v1157_v34, 1  ;;  %v1380_v43 = vsel %vm1340_vm3, %v1131_v30, %v1379_v38 }
  0xb9   : > { %v1381_v44 = vsel %vm1342_vm4, %v1138_v37, %v1380_v43  ;;  %v706_v14 = vcombine.high %v284_v11, %v2028_v5  ;;  %v713_v22 = vrot.slane %v284_v11, %v2189_v9  ;;  %v757_v47 = vcombine.high %v285_v39, %v2028_v5 }
  0xba   : > { %v1159_v48 = vadd.f32 %v1158_v42, %v1157_v34  ;;  %v1382_v49 = vsel %vm1344_vm5, %v1145_v40, %v1381_v44  ;;  %v764_v50 = vrot.slane %v285_v39, %v2189_v9  ;;  %v772_v51 = vcombine.high %v286_v23, %v2028_v5 }
  0xbb   : > { %v1383_v52 = vsel %vm1346_vm6, %v1152_v41, %v1382_v49  ;;  %v720_v53 = vrot.slane %v706_v14, %v2189_v9  ;;  %v721_v54 = vcombine.low %v698_v25, %v713_v22  ;;  %v722_v45 = vcombine.high %v698_v25, %v713_v22 }
  0xbc   : > { %v1384_v55 = vsel %vm1348_vm7, %v1159_v48, %v1383_v52  ;;  %v2442_v56 = vrot.slane %v757_v47, %v2189_v9  ;;  %v779_v57 = vrot.slane %v286_v23, %v2189_v9  ;;  %v2446_v58 = vrot.slane %v772_v51, %v2189_v9 }
  0xbd   : > { %1444 = vadd.xlane.f32.xlu1 %v1384_v55  ;;  %v729_v59 = vrot.slane %v721_v54, %v2194_v12  ;;  %v736_v60 = vrot.slane %v722_v45, %v2194_v12  ;;  %v737_v61 = vcombine.low %v705_v26, %v720_v53  ;;  %v738_v62 = vcombine.high %v705_v26, %v720_v53 }
  0xbe   : > { %v787_v63 = vcombine.low %v764_v50, %v779_v57  ;;  %v788_v1 = vcombine.high %v764_v50, %v779_v57  ;;  %v803_v3 = vcombine.low %v2442_v56, %v2446_v58  ;;  %v804_v35 = vcombine.high %v2442_v56, %v2446_v58 }
  0xbf   : > { %v745_v4 = vrot.slane %v737_v61, %v2194_v12  ;;  %v752_v9 = vrot.slane %v738_v62, %v2194_v12  ;;  %v753_v7 = vcombine.high %v729_v59, %v2028_v5  ;;  %v754_v8 = vcombine.high %v736_v60, %v2028_v5 }
  0xc0   : > { %v1160_v10 = vsel %vm823_vm0, %v729_v59, 0.0  ;;  %v1174_v36 = vsel %vm823_vm0, %v736_v60, 0.0  ;;  %v2461_v13 = vrot.slane %v787_v63, %v2194_v12  ;;  %v2464_v15 = vrot.slane %v788_v1, %v2194_v12 }
  0xc1   : > { %v755_v16 = vcombine.high %v745_v4, %v2028_v5  ;;  %v756_v17 = vcombine.high %v752_v9, %v2028_v5  ;;  %v1161_v18 = vrot.slane %v1160_v10, 4  ;;  %v1167_v19 = vsel %vm823_vm0, %v753_v7, 0.0 }
  0xc2   : > { %v1168_v20 = vrot.slane %v1167_v19, 4  ;;  %v1175_v21 = vrot.slane %v1174_v36, 4  ;;  %v1181_v24 = vsel %vm823_vm0, %v754_v8, 0.0  ;;  %v1188_v27 = vsel %vm823_vm0, %v745_v4, 0.0 }
  0xc3   : > { %v1162_v28 = vadd.f32 %v1161_v18, %v1160_v10  ;;  %v1182_v29 = vrot.slane %v1181_v24, 4  ;;  %v1189_v30 = vrot.slane %v1188_v27, 4  ;;  %v1195_v31 = vsel %vm823_vm0, %v755_v16, 0.0 }
  0xc4   : > { %v1169_v32 = vadd.f32 %v1168_v20, %v1167_v19  ;;  %v1176_v33 = vadd.f32 %v1175_v21, %v1174_v36  ;;  %v1196_v46 = vrot.slane %v1195_v31, 4  ;;  %v1202_v34 = vsel %vm823_vm0, %v752_v9, 0.0 }
  0xc5   : > { %v1163_v2 = vrot.slane %v1162_v28, 2  ;;  %v1183_v11 = vadd.f32 %v1182_v29, %v1181_v24  ;;  %v1190_v37 = vadd.f32 %v1189_v30, %v1188_v27  ;;  %v1203_v38 = vrot.slane %v1202_v34, 4 }
  0xc6   : > { %v1170_v25 = vrot.slane %v1169_v32, 2  ;;  %v1177_v26 = vrot.slane %v1176_v33, 2  ;;  %v1197_v39 = vadd.f32 %v1196_v46, %v1195_v31  ;;  %v1209_v40 = vsel %vm823_vm0, %v756_v17, 0.0 }
  0xc7   : > { %v1164_v41 = vadd.f32 %v1163_v2, %v1162_v28  ;;  %v1184_v42 = vrot.slane %v1183_v11, 2  ;;  %v1191_v43 = vrot.slane %v1190_v37, 2  ;;  %v1204_v44 = vadd.f32 %v1203_v38, %v1202_v34 }
  0xc8   : > { %v1171_v14 = vadd.f32 %v1170_v25, %v1169_v32  ;;  %v1178_v22 = vadd.f32 %v1177_v26, %v1176_v33  ;;  %v1198_v23 = vrot.slane %v1197_v39, 2  ;;  %v1210_v47 = vrot.slane %v1209_v40, 4 }
  0xc9   : > { %v1165_v48 = vrot.slane %v1164_v41, 1  ;;  %v1185_v49 = vadd.f32 %v1184_v42, %v1183_v11  ;;  %v1192_v50 = vadd.f32 %v1191_v43, %v1190_v37  ;;  %v1205_v51 = vrot.slane %v1204_v44, 2 }
  0xca   : > { %v1172_v52 = vrot.slane %v1171_v14, 1  ;;  %v1179_v53 = vrot.slane %v1178_v22, 1  ;;  %v1199_v54 = vadd.f32 %v1198_v23, %v1197_v39  ;;  %v1211_v45 = vadd.f32 %v1210_v47, %v1209_v40 }
  0xcb   : > { %v1166_v55 = vadd.f32 %v1165_v48, %v1164_v41  ;;  %v1186_v57 = vrot.slane %v1185_v49, 1  ;;  %v1193_v59 = vrot.slane %v1192_v50, 1  ;;  %v1206_v60 = vadd.f32 %v1205_v51, %v1204_v44 }
  0xcc   : > { %v1173_v61 = vadd.f32 %v1172_v52, %v1171_v14  ;;  %v1180_v62 = vadd.f32 %v1179_v53, %v1178_v22  ;;  %v1200_v63 = vrot.slane %v1199_v54, 1  ;;  %v1212_v1 = vrot.slane %v1211_v45, 2 }
  0xcd   : > { %v1187_v4 = vadd.f32 %v1186_v57, %v1185_v49  ;;  %v1194_v9 = vadd.f32 %v1193_v59, %v1192_v50  ;;  %v1207_v7 = vrot.slane %v1206_v60, 1  ;;  %v811_v8 = vrot.slane %v803_v3, %v2194_v12 }
  0xce   : > { %v1201_v10 = vadd.f32 %v1200_v63, %v1199_v54  ;;  %v1213_v36 = vadd.f32 %v1212_v1, %v1211_v45  ;;  %v1385_v16 = vsel %vm1336_vm1, %v1173_v61, %v1166_v55  ;;  %v818_v17 = vrot.slane %v804_v35, %v2194_v12 }
  0xcf   : > { %v1208_v18 = vadd.f32 %v1207_v7, %v1206_v60  ;;  %v1386_v19 = vsel %vm1338_vm2, %v1180_v62, %v1385_v16  ;;  %v819_v20 = vcombine.high %v2461_v13, %v2028_v5  ;;  %v820_v21 = vcombine.high %v2464_v15, %v2028_v5 }
  0xd0   : > { %v1214_v24 = vrot.slane %v1213_v36, 1  ;;  %v1387_v3 = vsel %vm1340_vm3, %v1187_v4, %v1386_v19  ;;  %v821_v27 = vcombine.high %v811_v8, %v2028_v5  ;;  %v822_v28 = vcombine.high %v818_v17, %v2028_v5 }
  0xd1   : > { %v1388_v29 = vsel %vm1342_vm4, %v1194_v9, %v1387_v3  ;;  %v1216_v12 = vsel %vm823_vm0, %v2461_v13, 0.0  ;;  %v1223_v56 = vsel %vm823_vm0, %v819_v20, 0.0  ;;  %v1230_v58 = vsel %vm823_vm0, %v2464_v15, 0.0 }
  0xd2   : > { %v1215_v35 = vadd.f32 %v1214_v24, %v1213_v36  ;;  %v1389_v30 = vsel %vm1344_vm5, %v1201_v10, %v1388_v29  ;;  %v1217_v31 = vrot.slane %v1216_v12, 4  ;;  %v1224_v32 = vrot.slane %v1223_v56, 4 }
  0xd3   : > { %v1390_v33 = vsel %vm1346_vm6, %v1208_v18, %v1389_v30  ;;  %v1231_v46 = vrot.slane %v1230_v58, 4  ;;  %v1237_v34 = vsel %vm823_vm0, %v820_v21, 0.0  ;;  %v1244_v2 = vsel %vm823_vm0, %v811_v8, 0.0  ;;  %v1460_v30 = vld [vmem:[%s2608_s1 + $0x10] sm:$0xff] }
  0xd4   : > { %v1391_v11 = vsel %vm1348_vm7, %v1215_v35, %v1390_v33  ;;  %v1218_v13 = vadd.f32 %v1217_v31, %v1216_v12  ;;  %v1225_v37 = vadd.f32 %v1224_v32, %v1223_v56  ;;  %v1238_v38 = vrot.slane %v1237_v34, 4  ;;  %v1461_v31 = vld [vmem:[%s2608_s1 + $0x18] sm:$0xff] }
  0xd5   : > { %1446 = vadd.xlane.f32.xlu0 %v1391_v11  ;;  %v1232_v25 = vadd.f32 %v1231_v46, %v1230_v58  ;;  %v1245_v15 = vrot.slane %v1244_v2, 4  ;;  %v1251_v26 = vsel %vm823_vm0, %v821_v27, 0.0  ;;  %v1258_v39 = vsel %vm823_vm0, %v818_v17, 0.0  ;;  %v1458_v27 = vld [vmem:[%s2608_s1] sm:$0xff] }
  0xd6   : > { %v1219_v40 = vrot.slane %v1218_v13, 2  ;;  %v1226_v41 = vrot.slane %v1225_v37, 2  ;;  %v1239_v42 = vadd.f32 %v1238_v38, %v1237_v34  ;;  %v1252_v43 = vrot.slane %v1251_v26, 4  ;;  %v1463_v38 = vld [vmem:[%s2608_s1 + $0x28] sm:$0xff] }
  0xd7   : > { %v1233_v44 = vrot.slane %v1232_v25, 2  ;;  %v1246_v14 = vadd.f32 %v1245_v15, %v1244_v2  ;;  %v1259_v22 = vrot.slane %v1258_v39, 4  ;;  %v1265_v23 = vsel %vm823_vm0, %v822_v28, 0.0  ;;  %v1459_v28 = vld [vmem:[%s2608_s1 + $0x8] sm:$0xff]  ;;  %v1464_v15 = vld [vmem:[%s2608_s1 + $0x30] sm:$0xff] }
  0xd8   : > { %v1220_v47 = vadd.f32 %v1219_v40, %v1218_v13  ;;  %v1227_v48 = vadd.f32 %v1226_v41, %v1225_v37  ;;  %v1240_v49 = vrot.slane %v1239_v42, 2  ;;  %v1253_v50 = vadd.f32 %v1252_v43, %v1251_v26  ;;  %v1462_v37 = vld [vmem:[%s2608_s1 + $0x20] sm:$0xff]  ;;  %v1465_v26 = vld [vmem:[%s2608_s1 + $0x38] sm:$0xff] }
  0xd9   : > { %v1234_v51 = vadd.f32 %v1233_v44, %v1232_v25  ;;  %v1247_v52 = vrot.slane %v1246_v14, 2  ;;  %v1260_v53 = vadd.f32 %v1259_v22, %v1258_v39  ;;  %v1266_v54 = vrot.slane %v1265_v23, 4 }
  0xda   : > { %v1221_v45 = vrot.slane %v1220_v47, 1  ;;  %v1228_v55 = vrot.slane %v1227_v48, 1  ;;  %v1241_v57 = vadd.f32 %v1240_v49, %v1239_v42  ;;  %v1254_v59 = vrot.slane %v1253_v50, 2 }
  0xdb   : > { %v1235_v60 = vrot.slane %v1234_v51, 1  ;;  %v1248_v61 = vadd.f32 %v1247_v52, %v1246_v14  ;;  %v1261_v62 = vrot.slane %v1260_v53, 2  ;;  %v1267_v63 = vadd.f32 %v1266_v54, %v1265_v23 }
  0xdc   : > { %v1222_v1 = vadd.f32 %v1221_v45, %v1220_v47  ;;  %v1229_v4 = vadd.f32 %v1228_v55, %v1227_v48  ;;  %v1242_v9 = vrot.slane %v1241_v57, 1  ;;  %v1255_v7 = vadd.f32 %v1254_v59, %v1253_v50 }
  0xdd   : > { %v1236_v8 = vadd.f32 %v1235_v60, %v1234_v51  ;;  %v1249_v10 = vrot.slane %v1248_v61, 1  ;;  %v1262_v36 = vadd.f32 %v1261_v62, %v1260_v53  ;;  %v1268_v16 = vrot.slane %v1267_v63, 2 }
  0xde   : > { %v1243_v17 = vadd.f32 %v1242_v9, %v1241_v57  ;;  %v1256_v18 = vrot.slane %v1255_v7, 1  ;;  %v1392_v19 = vsel %vm1336_vm1, %v1229_v4, %v1222_v1  ;;  %v2029_v33 = vmov 0.0|0.0  }
  0xdf   : > { %v1250_v20 = vadd.f32 %v1249_v10, %v1248_v61  ;;  %v1263_v21 = vrot.slane %v1262_v36, 1  ;;  %v1269_v24 = vadd.f32 %v1268_v16, %v1267_v63  ;;  %v1393_v3 = vsel %vm1338_vm2, %v1236_v8, %v1392_v19  ;;  %1828 = vmatprep.subr.bf16.mxu0 %v2029_v33 }
  0xe0   : > { %v1257_v29 = vadd.f32 %v1256_v18, %v1255_v7  ;;  %v1394_v12 = vsel %vm1340_vm3, %v1243_v17, %v1393_v3  ;;  %v1829_v46 = vpack.c.bf16 %v1459_v28, %v1458_v27  ;;  %v1832_v11 = vpack.c.bf16 %v1461_v31, %v1460_v30 }
  0xe1   : > { %v1264_v56 = vadd.f32 %v1263_v21, %v1262_v36  ;;  %v1270_v58 = vrot.slane %v1269_v24, 1  ;;  %v1395_v35 = vsel %vm1342_vm4, %v1250_v20, %v1394_v12  ;;  %v1835_v25 = vpack.c.bf16 %v1463_v38, %v1462_v37 }
  0xe2   : > { %v1396_v32 = vsel %vm1344_vm5, %v1257_v29, %v1395_v35  ;;  %1830 = vmatpush3.bf16.msra.mxu0 %v1829_v46  ;;  %v1838_v39 = vpack.c.bf16 %v1465_v26, %v1464_v15  ;;  %v1476_v41 = vand.u32 127, %v299_v0  ;;  %vm1514_vm13 = vcmask 392512   ;;  %v1604_v35 = vld [vmem:[%s2610_s3] sm:$0xf] }
  0xe3   : > { %v1271_v34 = vadd.f32 %v1270_v58, %v1269_v24  ;;  %v1397_v2 = vsel %vm1346_vm6, %v1264_v56, %v1396_v32  ;;  %1831 = vmatprep.subr.bf16.mxu0 %v2029_v33  ;;  %vm1521_vm14 = vcmask 458112   ;;  %vm1528_vm15 = vcmask 523712   ;;  %v1605_v46 = vld [vmem:[%s2611_s4] sm:$0x1] }
  0xe4   : > { %v1481_v42 = vadd.s32 4294967288, %v1476_v41  ;;  %v1488_v23 = vadd.s32 4294967280, %v1476_v41  ;;  %v1479_v47 = vsub.s32 %v1476_v41, %v2186_v6  ;;  %v1495_v49 = vadd.s32 4294967272, %v1476_v41 }
  0xe5   : > { %v1398_v13 = vsel %vm1348_vm7, %v1271_v34, %v1397_v2  ;;  %v1502_v54 = vadd.s32 4294967264, %v1476_v41  ;;  %v1509_v59 = vadd.s32 4294967256, %v1476_v41  ;;  %v1516_v1 = vadd.s32 4294967248, %v1476_v41 }
  0xe6   : > { %1448 = vadd.xlane.f32.xlu1 %v1398_v13  ;;  %1833 = vmatpush3.bf16.msra.mxu0 %v1832_v11  ;;  %v1484_v14 = vsub.s32 %v1481_v42, %v2186_v6  ;;  %v1491_v53 = vsub.s32 %v1488_v23, %v2186_v6  ;;  %v1498_v45 = vsub.s32 %v1495_v49, %v2186_v6  ;;  %v1523_v19 = vadd.s32 4294967240, %v1476_v41 }
  0xe7   : > { %1834 = vmatprep.subr.bf16.mxu0 %v2029_v33  ;;  %v1505_v61 = vsub.s32 %v1502_v54, %v2186_v6  ;;  %v1512_v8 = vsub.s32 %v1509_v59, %v2186_v6  ;;  %v1519_v16 = vsub.s32 %v1516_v1, %v2186_v6  ;;  %vm1530_vm0 = vcmask 523264  }
  0xe8   : > { %v1526_v3 = vsub.s32 %v1523_v19, %v2186_v6  ;;  %vm1610_vm1 = vcmask 1043456   ;;  %v1466_v6 = vld [vmem:[%s2609_s2] sm:$0x1]  ;;  %vm1606_vm2 = vcmask 31744   ;;  %vm1685_vm3 = vcmask 516096  }
  0xe9   : > { %1824 = vmatpush3.msk.msra.mxu1 %vm1610_vm1, %v1604_v35 }
  0xea   : > { %1836 = vmatpush3.bf16.msra.mxu0 %v1835_v25  ;;  %v1435_v40 = vpop.xlane.xlu0 %1434 }
  0xeb   : > { %1837 = vmatprep.subr.bf16.mxu0 %v2029_v33  ;;  %v1450_v48 = vmul.f32 0.00390625, %v1435_v40 }
  0xed   : > { %v1480_v0 = vrot.slane %v1450_v48, %v1479_v47 }
  0xee   : > { %1839 = vmatpush3.bf16.msra.mxu0 %v1838_v39 }
  0xfa   : > { %v1439_v43 = vpop.xlane.xlu1 %1438 }
  0xfb   : > { %v1452_v5 = vmul.f32 0.00390625, %v1439_v43 }
  0xfd   : > { %v1492_v60 = vrot.slane %v1452_v5, %v1491_v53 }
 0x111   : > { %v1437_v44 = vpop.xlane.xlu0 %1436 }
 0x112   : > { %v1451_v22 = vmul.f32 0.00390625, %v1437_v44 }
 0x114   : > { %v1485_v51 = vrot.slane %v1451_v22, %v1484_v14 }
 0x116   : > { %v1487_v57 = vsel %vm1486_vm9, %v1485_v51, %v1480_v0 }
 0x117   : > { %v1494_v7 = vsel %vm1493_vm10, %v1492_v60, %v1487_v57 }
 0x123   : > { %v1441_v50 = vpop.xlane.xlu1 %1440 }
 0x124   : > { %v1453_v55 = vmul.f32 0.00390625, %v1441_v50 }
 0x126   : > { %v1499_v4 = vrot.slane %v1453_v55, %v1498_v45 }
 0x128   : > { %v1501_v18 = vsel %vm1500_vm11, %v1499_v4, %v1494_v7 }
 0x139   : > { %v1443_v52 = vpop.xlane.xlu0 %1442 }
 0x13a   : > { %v1454_v62 = vmul.f32 0.00390625, %v1443_v52 }
 0x13c   : > { %v1506_v36 = vrot.slane %v1454_v62, %v1505_v61 }
 0x13e   : > { %v1508_v21 = vsel %vm1507_vm12, %v1506_v36, %v1501_v18 }
 0x14a   : > { %v1445_v63 = vpop.xlane.xlu1 %1444 }
 0x14b   : > { %v1455_v10 = vmul.f32 0.00390625, %v1445_v63 }
 0x14d   : > { %v1513_v20 = vrot.slane %v1455_v10, %v1512_v8 }
 0x14f   : > { %v1515_v28 = vsel %vm1514_vm13, %v1513_v20, %v1508_v21 }
 0x162   : > { %v1447_v9 = vpop.xlane.xlu0 %1446 }
 0x163   : > { %v1456_v17 = vmul.f32 0.00390625, %v1447_v9 }
 0x165   : > { %v1520_v24 = vrot.slane %v1456_v17, %v1519_v16 }
 0x167   : > { %v1522_v12 = vsel %vm1521_vm14, %v1520_v24, %v1515_v28 }
 0x173   : > { %v1449_v27 = vpop.xlane.xlu1 %1448 }
 0x174   : > { %v1457_v29 = vmul.f32 0.00390625, %v1449_v27 }
 0x176   : > { %v1527_v56 = vrot.slane %v1457_v29, %v1526_v3 }
 0x178   : > { %v1529_v58 = vsel %vm1528_vm15, %v1527_v56, %v1522_v12 }
 0x179   : > { %1821 = vmatmul.mubr.msk.f32.vlgmr.msra.gmra.mrb[0].mxu0 %vm1530_vm0, %v1529_v58 }
 0x24c   : > { %v1599_v30 = vpop.f32.mrb[0].mxu0 }
 0x24d   : > { %v1600_v31 = vadd.f32 %v1599_v30, %v1466_v6  ;;  %v1822_v32 = vpop.f32.mrb[1].mxu0 }
 0x24f   : > { %v1603_v33 = vmax.f32 %v1600_v31, 0.0 }
 0x251   : > { %1826 = vmatmul.mubr.msk.f32.vlgmr.msra.gmra.mrb[0].mxu1 %vm1606_vm2, %v1603_v33 }
 0x324   : > { %v1680_v34 = vpop.f32.mrb[0].mxu1 }
 0x325   : > { %v1681_v2 = vadd.f32 %v1680_v34, %v1605_v46  ;;  %v1827_v11 = vpop.f32.mrb[1].mxu1 }
 0x327   : > { %v1684_v13 = vmax.f32 %v1681_v2, 0.0 }
 0x329   : > { %1686 = vst.msk [vmem:[%s257_s25] sm:$0x1] %vm1685_vm3, %v1684_v13 }
 0x32a   : > { %1952 = shalt.err (!%p1949_p5)
}
 0x32b   : > { %s1953_s29 = scalar_lea.hbm %s2558_s11, 16  ;;  %s1957_s12 = scalar_lea.hbm %s2612_s5, 32 }
 0x32c   : > { %p1954_p4 = scmp.ne.s32.totalorder %s2558_s11, %s1953_s29  ;;  %p1958_p12 = scmp.lt.u32.totalorder %s2558_s11, %s2612_s5 }
 0x32d   : > { %p1959_p1 = scmp.lt.u32.totalorder %s1957_s12, %s1953_s29  ;;  %p1961_p8 = scmp.lt.u32.totalorder %s1953_s29, %s2558_s11 }
 0x32e   : > { %p1955_p7 = pnand %p1954_p4, %p2620_p9 }
 0x32f   : > { %p1960_p3 = por %p1959_p1, %p1958_p12 }
 0x330   : > { %p1956_p10 = pneg %p1955_p7 }
 0x331   : > { %p1962_p11 = por %p1961_p8, %p1960_p3 }
 0x333   : > { %p1963_p0 = pnand %p1962_p11, %p1956_p10 }
 0x335   : > { %1966 = shalt.err (!%p1963_p0)
}
 0x336   : > { %1842 = dma.vmem_to_hbm [thread:$0]  (%p2620_p9), %s2560_s27, 16, %s2558_s11, %s1688_s30  }
 0x337 PF: > { %s1712_s25 = sand.u32 1, %s2001_s18   ;;  %p2621_p6 = scmp.ne.s32.totalorder %s2617_s8, 0 }
 0x338   : > { %p2622_p13 = scmp.ge.s32.totalorder %s2021_s23, 2  ;;  %s1713_s28 = scalar_lea.sflag [#allocation5], %s1712_s25 }
 0x33a   : > { %p1849_p2 = pnand %p2622_p13, %p2621_p6 }
 0x33c   : > { %1996 = dma.done.wait (!%p1849_p2), %s1713_s28, 16  }
 0x33d   : > { %1998 = vsyncadd (!%p1849_p2), %s1713_s28, 4294967280  ;;  %s21_s23 = sadd.s32 1, %s2021_s23   ;;  %s2623_s18 = smov %s2005_s19 }
 0x33e   : > { %p18_p5 = scmp.ge.s32.totalorder %s21_s23, 4   ;;  %s2624_s19 = smov %s2009_s20 }
 0x33f   : > { %s2625_s20 = smov %s2118_s7  ;;  %s2626_s21 = smov %s2017_s22 }
 0x340   : > { %s2627_s22 = smov %s2629_s26  ;;  %20 = sbr.rel (!%p18_p5) target bundleno = 6 (0x6), region = 93 }
 0x347   :  { %1717 = vsyncpa [#allocation4], 1 }
 0x348   :  { %1719 = vsyncpa [#allocation4 + $0x1], 1 }
 0x349   :  { %1720 = vsyncpa [#allocation5], 1 }
 0x34a   :  { %1722 = vsyncpa [#allocation5 + $0x1], 1 }

</bundles_post_ra>
